<compile_context>
chip_gen: v7x
topology: tpu7x:2x2x1
jax: 0.10.0
libtpu: 0.0.40
codegen_flags: <defaults>
</compile_context>

<pallas_src>
import math
import functools

import jax
import jax.numpy as jnp
from jax import lax
from jax.experimental import pallas as pl
from jax.experimental.pallas import tpu as pltpu


# -----------------------------------------------------------------------------
# Fused kernel:
#   K-tiled encoder GEMM (int8 weights -> bf16 MXU, f32 VMEM accumulator)
#   -> per-column dequant scales + class-conditional latent-average shift
#      (label index gathered from SMEM scalar-prefetch, broadcast in-kernel)
#   -> decoder/interpreter + face_pool surrogate (pre-folded weight, f32 GEMM)
# -----------------------------------------------------------------------------
def _psp_kernel(idx_ref, x_ref, we_ref, scale_ref, la_ref, wd_ref, *refs,
                n_classes, with_codes):
    if with_codes:
        codes_ref, img_ref, acc_ref = refs
    else:
        img_ref, acc_ref = refs

    k = pl.program_id(0)

    @pl.when(k == 0)
    def _init():
        acc_ref[...] = jnp.zeros_like(acc_ref)

    # Streamed encoder reduction step. The int8 weight tile is dequantized to
    # bf16 (exact: |q| <= 127) on the VPU, hidden under the weight DMA; the MXU
    # runs bf16 x bf16 with f32 accumulation into VMEM scratch.
    w_tile = we_ref[...].astype(jnp.float32).astype(jnp.bfloat16)
    acc_ref[...] += jnp.dot(x_ref[...].astype(jnp.bfloat16), w_tile,
                            preferred_element_type=jnp.float32)

    @pl.when(k == pl.num_programs(0) - 1)
    def _finalize():
        B, N = acc_ref.shape
        # latent_avg gather: the SMEM label index selects a row of the
        # pre-tiled (n_classes, N) table via mask + sublane reduce (VPU/XLU).
        la_all = la_ref[...]                                     # (n_classes, N)
        cls_iota = lax.broadcasted_iota(jnp.int32, (n_classes, N), 0)
        rows = []
        for b in range(B):
            sel = jnp.where(cls_iota == idx_ref[b], la_all, 0.0)
            rows.append(jnp.sum(sel, axis=0, keepdims=True))     # (1, N)
        shift = jnp.concatenate(rows, axis=0)                    # (B, N)

        # Per-column int8 scales + latent shift, all in f32 (no double rounding
        # of the codes before the decoder matmul).
        codes = acc_ref[...] * scale_ref[...] + shift
        if with_codes:
            codes_ref[...] = codes
        # Decoder/interpreter + face_pool: style-mean (A) and AdaptiveAvgPool2d
        # are pre-folded into wd_ref at init, so this is a single small matmul.
        img_ref[...] = jnp.dot(codes, wd_ref[...],
                               preferred_element_type=jnp.float32)


def psp_forward_pallas(idx, x_flat, w_enc_i8, enc_scale, latent_avg_tiled,
                       w_dec_eff, *, with_codes, tk):
    """codes = (x @ dequant(w_enc)) + latent_avg[idx] ; images = codes @ w_dec_eff."""
    B, K = x_flat.shape
    K2, N = w_enc_i8.shape
    N2, M = w_dec_eff.shape
    n_classes = latent_avg_tiled.shape[0]
    assert K == K2 and N == N2
    assert K % tk == 0 and tk % 128 == 0
    assert N % 128 == 0 and M % 128 == 0 and B % 8 == 0

    kernel = functools.partial(_psp_kernel, n_classes=n_classes,
                               with_codes=with_codes)

    out_shape = []
    out_specs = []
    if with_codes:
        out_shape.append(jax.ShapeDtypeStruct((B, N), jnp.float32))
        out_specs.append(pl.BlockSpec((B, N), lambda k, idx_ref: (0, 0)))
    out_shape.append(jax.ShapeDtypeStruct((B, M), jnp.float32))
    out_specs.append(pl.BlockSpec((B, M), lambda k, idx_ref: (0, 0)))

    grid_spec = pltpu.PrefetchScalarGridSpec(
        num_scalar_prefetch=1,                      # idx -> SMEM
        grid=(K // tk,),                            # stream the encoder weight
        in_specs=[
            pl.BlockSpec((B, tk), lambda k, idx_ref: (0, k)),         # x tile
            pl.BlockSpec((tk, N), lambda k, idx_ref: (k, 0)),         # w_enc int8 tile
            pl.BlockSpec((1, N), lambda k, idx_ref: (0, 0)),          # per-col scales
            pl.BlockSpec((n_classes, N), lambda k, idx_ref: (0, 0)),  # latent_avg (tiled)
            pl.BlockSpec((N, M), lambda k, idx_ref: (0, 0)),          # w_dec (folded)
        ],
        out_specs=tuple(out_specs),
        scratch_shapes=[pltpu.VMEM((B, N), jnp.float32)],             # f32 acc
    )

    outs = pl.pallas_call(
        kernel,
        out_shape=tuple(out_shape),
        grid_spec=grid_spec,
        compiler_params=pltpu.CompilerParams(
            dimension_semantics=("arbitrary",),
            # v7x-safe ceiling (64 MiB physical); plenty on v5e/v6e (128 MiB).
            vmem_limit_bytes=48 * 1024 * 1024),
    )(idx, x_flat, w_enc_i8, enc_scale, latent_avg_tiled, w_dec_eff)

    if with_codes:
        codes, img = outs
        return codes, img
    (img,) = outs
    return None, img


def _pick_tk(K, target=1024):
    """Largest K-tile <= target that is a multiple of 256 and divides K."""
    if K <= target:
        return K
    for tk in range(target, 0, -256):
        if tk % 256 == 0 and K % tk == 0:
            return tk
    return K


# -----------------------------------------------------------------------------
# pSp module (synthetic parameters, deterministic init)
# -----------------------------------------------------------------------------
class PSPPallas:
    def __init__(self, *, output_size=32, style_dim=64, in_ch=3, in_hw=32,
                 n_classes=4, out_ch=4, pool_hw=8, seed=42):
        # n_styles = log2(output_size) * 2 - 2, exactly as in pSp.__init__
        # (bit_length avoids the float-log off-by-one).
        self.n_styles = (output_size.bit_length() - 1) * 2 - 2
        self.output_size = output_size
        self.style_dim = style_dim
        self.in_ch, self.in_hw = in_ch, in_hw
        self.n_classes = n_classes
        self.out_ch = out_ch          # interpreter output: image chans + mask chan
        self.pool_hw = pool_hw        # small-shape analog of AdaptiveAvgPool2d((256,256))

        S, D, P = output_size, style_dim, pool_hw
        N = self.n_styles * D
        enc_in = in_ch * in_hw * in_hw
        self.tk = _pick_tk(enc_in)

        k0, k1, k2 = jax.random.split(jax.random.PRNGKey(seed), 3)

        # Encoder surrogate: flattened image -> n_styles * style_dim codes.
        # Stored int8 with per-column scales (dominant HBM read of the forward).
        w_enc = jax.random.normal(k0, (enc_in, N), jnp.float32) * (1.0 / math.sqrt(enc_in))
        col_max = jnp.max(jnp.abs(w_enc), axis=0, keepdims=True)          # (1, N)
        scale = jnp.where(col_max > 0, col_max / 127.0, 1.0)
        self.w_enc_q = jnp.clip(jnp.round(w_enc / scale), -127, 127).astype(jnp.int8)
        self.enc_scale = scale.astype(jnp.float32)                        # (1, N)

        # latent_avg, indexed by argmax(label); pre-tiled over styles (tiny, f32).
        latent_avg = jax.random.normal(k1, (n_classes, D), jnp.float32) * 0.1
        self.latent_avg_tiled = jnp.tile(latent_avg, (1, self.n_styles))  # (n_classes, N)

        # Decoder + interpreter surrogate: style-mean(w+) -> out_ch x S x S.
        w_dec = jax.random.normal(k2, (D, out_ch * S * S), jnp.float32) * (1.0 / math.sqrt(D))

        # Style-mean fold: A[s*D + d, d] = 1/n_styles, so codes_flat @ A == mean over styles.
        A = jnp.tile(jnp.eye(D, dtype=jnp.float32), (self.n_styles, 1)) / self.n_styles  # (N, D)

        # AdaptiveAvgPool2d as a linear map on flattened spatial dims, folded into w_dec.
        r = S // P
        h = jnp.arange(S)
        src = (h[:, None] * S + h[None, :]).reshape(-1)
        dst = ((h // r)[:, None] * P + (h // r)[None, :]).reshape(-1)
        pool_mat = jnp.zeros((S * S, P * P), jnp.float32).at[src, dst].set(1.0 / (r * r))
        w_dec_pooled = jnp.matmul(w_dec.reshape(D, out_ch, S * S), pool_mat
                                  ).reshape(D, out_ch * P * P)

        # Effective decoder weights (style-mean folded in); small, kept f32 so
        # the second matmul sees f32 codes x f32 weights.
        self.w_dec_pooled_eff = A @ w_dec_pooled                          # (N, out_ch*P*P)
        self.w_dec_full_eff = A @ w_dec                                   # (N, out_ch*S*S)

        # Single jitted forward: all glue (argmax, pad, reshape, slice) fuses
        # around the one pallas_call.
        def _fwd(x, label, *, resize, return_latents):
            B = x.shape[0]
            x_flat = x.reshape(B, -1)
            idx = jnp.argmax(label, axis=-1).astype(jnp.int32)

            # Pad batch to a multiple of 8 sublanes -> unmasked output stores;
            # padded rows use class 0 and are sliced away below.
            B_pad = max(8, ((B + 7) // 8) * 8)
            if B_pad != B:
                x_flat = jnp.pad(x_flat, ((0, B_pad - B), (0, 0)))
                idx = jnp.pad(idx, (0, B_pad - B))

            w_dec_eff = self.w_dec_pooled_eff if resize else self.w_dec_full_eff
            hw = self.pool_hw if resize else self.output_size

            codes_flat, img_flat = psp_forward_pallas(
                idx, x_flat, self.w_enc_q, self.enc_scale,
                self.latent_avg_tiled, w_dec_eff,
                with_codes=return_latents, tk=self.tk)

            images = img_flat[:B].reshape(B, self.out_ch, hw, hw)         # NCHW
            if return_latents:
                codes = codes_flat[:B].reshape(B, self.n_styles, self.style_dim)
                return images, codes
            return images

        self._fwd = jax.jit(_fwd, static_argnames=("resize", "return_latents"))

    def __call__(self, x, label, *, resize=True, return_latents=False):
        return self._fwd(x, label, resize=resize, return_latents=return_latents)


# -----------------------------------------------------------------------------
if __name__ == "__main__":
    model = PSPPallas(output_size=32, style_dim=64, in_ch=3, in_hw=32,
                      n_classes=4, out_ch=4, pool_hw=8, seed=42)

    key = jax.random.PRNGKey(0)
    kx, kl = jax.random.split(key)
    B = 2
    x = jax.random.normal(kx, (B, 3, 32, 32), jnp.float32)                # NCHW input
    label = jax.nn.one_hot(jax.random.randint(kl, (B,), 0, 4), 4,
                           dtype=jnp.float32)                             # (B, n_classes)

    images, codes = model(x, label, resize=True, return_latents=True)
    images = jax.block_until_ready(images)
    codes = jax.block_until_ready(codes)

    assert images.shape == (B, 4, 8, 8)
    assert codes.shape == (B, model.n_styles, model.style_dim)
    print("KERNEL_OK")
</pallas_src>

<mosaic_0001>
module attributes {stable_mosaic.version = 11 : i64} {
  func.func @_psp_kernel(%arg0: i32, %arg1: memref<8xi32, #tpu.memory_space<smem>>, %arg2: memref<8x1024xf32, #tpu.memory_space<vmem>>, %arg3: memref<1024x512xi8, #tpu.memory_space<vmem>>, %arg4: memref<1x512xf32, #tpu.memory_space<vmem>>, %arg5: memref<4x512xf32, #tpu.memory_space<vmem>>, %arg6: memref<512x256xf32, #tpu.memory_space<vmem>>, %arg7: memref<8x512xf32, #tpu.memory_space<vmem>>, %arg8: memref<8x256xf32, #tpu.memory_space<vmem>>, %arg9: memref<8x512xf32, #tpu.memory_space<vmem>>) attributes {dimension_semantics = [#tpu.dimension_semantics<arbitrary>], iteration_bounds = array<i64: 3>, scalar_prefetch = 1 : i64, scratch_operands = 1 : i64, tpu.core_type = #tpu.core_type<tc>, window_params = [{transform_indices = @transform_0, window_bounds = array<i64: 8, 1024>}, {transform_indices = @transform_1, window_bounds = array<i64: 1024, 512>}, {pipeline_mode = #tpu.pipeline_mode<synchronous>, transform_indices = @transform_2, window_bounds = array<i64: 1, 512>}, {pipeline_mode = #tpu.pipeline_mode<synchronous>, transform_indices = @transform_3, window_bounds = array<i64: 4, 512>}, {pipeline_mode = #tpu.pipeline_mode<synchronous>, transform_indices = @transform_4, window_bounds = array<i64: 512, 256>}, {pipeline_mode = #tpu.pipeline_mode<synchronous>, transform_indices = @transform_5, window_bounds = array<i64: 8, 512>}, {pipeline_mode = #tpu.pipeline_mode<synchronous>, transform_indices = @transform_6, window_bounds = array<i64: 8, 256>}]} {
    %c0_i32 = arith.constant 0 : i32
    %0 = arith.cmpi eq, %arg0, %c0_i32 : i32
    %1 = arith.extui %0 : i1 to i32
    %c0_i32_0 = arith.constant 0 : i32
    %2 = arith.cmpi ne, %1, %c0_i32_0 : i32
    scf.if %2 {
      %cst_9 = arith.constant 0.000000e+00 : f32
      %15 = vector.broadcast %cst_9 : f32 to vector<8x512xf32>
      %c0_10 = arith.constant 0 : index
      %c0_11 = arith.constant 0 : index
      %16 = vector.load %arg9[%c0_10, %c0_11] : memref<8x512xf32, #tpu.memory_space<vmem>>, vector<8x512xf32>
      tpu.vector_store %arg9[%c0_10, %c0_11], %15 {strides = array<i32>} : memref<8x512xf32, #tpu.memory_space<vmem>>, vector<8x512xf32>,
    } else {
    }
    %c0 = arith.constant 0 : index
    %c0_1 = arith.constant 0 : index
    %3 = vector.load %arg3[%c0, %c0_1] : memref<1024x512xi8, #tpu.memory_space<vmem>>, vector<1024x512xi8>
    %4 = arith.sitofp %3 : vector<1024x512xi8> to vector<1024x512xf32>
    %5 = arith.truncf %4 : vector<1024x512xf32> to vector<1024x512xbf16>
    %c0_2 = arith.constant 0 : index
    %c0_3 = arith.constant 0 : index
    %6 = vector.load %arg9[%c0_2, %c0_3] : memref<8x512xf32, #tpu.memory_space<vmem>>, vector<8x512xf32>
    %c0_4 = arith.constant 0 : index
    %c0_5 = arith.constant 0 : index
    %7 = vector.load %arg2[%c0_4, %c0_5] : memref<8x1024xf32, #tpu.memory_space<vmem>>, vector<8x1024xf32>
    %8 = arith.truncf %7 : vector<8x1024xf32> to vector<8x1024xbf16>
    %cst = arith.constant dense<0.000000e+00> : vector<8x512xf32>
    %9 = tpu.matmul %8, %5, %cst {dimension_numbers = #tpu.dot_dimension_numbers<[1], [0], [0], [1], [0, 0, 1, 1], [], []>} : vector<8x1024xbf16>, vector<1024x512xbf16>, vector<8x512xf32> -> vector<8x512xf32>
    %10 = arith.addf %6, %9 : vector<8x512xf32>
    %c0_6 = arith.constant 0 : index
    %c0_7 = arith.constant 0 : index
    %11 = vector.load %arg9[%c0_6, %c0_7] : memref<8x512xf32, #tpu.memory_space<vmem>>, vector<8x512xf32>
    tpu.vector_store %arg9[%c0_6, %c0_7], %10 {strides = array<i32>} : memref<8x512xf32, #tpu.memory_space<vmem>>, vector<8x512xf32>,
    %c2_i32 = arith.constant 2 : i32
    %12 = arith.cmpi eq, %arg0, %c2_i32 : i32
    %13 = arith.extui %12 : i1 to i32
    %c0_i32_8 = arith.constant 0 : i32
    %14 = arith.cmpi ne, %13, %c0_i32_8 : i32
    scf.if %14 {
      %c0_9 = arith.constant 0 : index
      %c0_10 = arith.constant 0 : index
      %15 = vector.load %arg5[%c0_9, %c0_10] : memref<4x512xf32, #tpu.memory_space<vmem>>, vector<4x512xf32>
      %16 = tpu.iota {dimensions = array<i32: 0>} : vector<4x512xi32>
      %c0_11 = arith.constant 0 : index
      %17 = memref.load %arg1[%c0_11] : memref<8xi32, #tpu.memory_space<smem>>
      %18 = vector.broadcast %17 : i32 to vector<4x512xi32>
      %19 = arith.cmpi eq, %16, %18 : vector<4x512xi32>
      %cst_12 = arith.constant 0.000000e+00 : f32
      %20 = vector.broadcast %cst_12 : f32 to vector<4x512xf32>
      %21 = arith.select %19, %15, %20 : vector<4x512xi1>, vector<4x512xf32>
      %cst_13 = arith.constant dense<0.000000e+00> : vector<512xf32>
      %22 = vector.multi_reduction <add>, %21, %cst_13 [0] : vector<4x512xf32> to vector<512xf32>
      %23 = vector.shape_cast %22 : vector<512xf32> to vector<1x512xf32>
      %c1 = arith.constant 1 : index
      %24 = memref.load %arg1[%c1] : memref<8xi32, #tpu.memory_space<smem>>
      %25 = vector.broadcast %24 : i32 to vector<4x512xi32>
      %26 = arith.cmpi eq, %16, %25 : vector<4x512xi32>
      %cst_14 = arith.constant 0.000000e+00 : f32
      %27 = vector.broadcast %cst_14 : f32 to vector<4x512xf32>
      %28 = arith.select %26, %15, %27 : vector<4x512xi1>, vector<4x512xf32>
      %cst_15 = arith.constant dense<0.000000e+00> : vector<512xf32>
      %29 = vector.multi_reduction <add>, %28, %cst_15 [0] : vector<4x512xf32> to vector<512xf32>
      %30 = vector.shape_cast %29 : vector<512xf32> to vector<1x512xf32>
      %c2 = arith.constant 2 : index
      %31 = memref.load %arg1[%c2] : memref<8xi32, #tpu.memory_space<smem>>
      %32 = vector.broadcast %31 : i32 to vector<4x512xi32>
      %33 = arith.cmpi eq, %16, %32 : vector<4x512xi32>
      %cst_16 = arith.constant 0.000000e+00 : f32
      %34 = vector.broadcast %cst_16 : f32 to vector<4x512xf32>
      %35 = arith.select %33, %15, %34 : vector<4x512xi1>, vector<4x512xf32>
      %cst_17 = arith.constant dense<0.000000e+00> : vector<512xf32>
      %36 = vector.multi_reduction <add>, %35, %cst_17 [0] : vector<4x512xf32> to vector<512xf32>
      %37 = vector.shape_cast %36 : vector<512xf32> to vector<1x512xf32>
      %c3 = arith.constant 3 : index
      %38 = memref.load %arg1[%c3] : memref<8xi32, #tpu.memory_space<smem>>
      %39 = vector.broadcast %38 : i32 to vector<4x512xi32>
      %40 = arith.cmpi eq, %16, %39 : vector<4x512xi32>
      %cst_18 = arith.constant 0.000000e+00 : f32
      %41 = vector.broadcast %cst_18 : f32 to vector<4x512xf32>
      %42 = arith.select %40, %15, %41 : vector<4x512xi1>, vector<4x512xf32>
      %cst_19 = arith.constant dense<0.000000e+00> : vector<512xf32>
      %43 = vector.multi_reduction <add>, %42, %cst_19 [0] : vector<4x512xf32> to vector<512xf32>
      %44 = vector.shape_cast %43 : vector<512xf32> to vector<1x512xf32>
      %c4 = arith.constant 4 : index
      %45 = memref.load %arg1[%c4] : memref<8xi32, #tpu.memory_space<smem>>
      %46 = vector.broadcast %45 : i32 to vector<4x512xi32>
      %47 = arith.cmpi eq, %16, %46 : vector<4x512xi32>
      %cst_20 = arith.constant 0.000000e+00 : f32
      %48 = vector.broadcast %cst_20 : f32 to vector<4x512xf32>
      %49 = arith.select %47, %15, %48 : vector<4x512xi1>, vector<4x512xf32>
      %cst_21 = arith.constant dense<0.000000e+00> : vector<512xf32>
      %50 = vector.multi_reduction <add>, %49, %cst_21 [0] : vector<4x512xf32> to vector<512xf32>
      %51 = vector.shape_cast %50 : vector<512xf32> to vector<1x512xf32>
      %c5 = arith.constant 5 : index
      %52 = memref.load %arg1[%c5] : memref<8xi32, #tpu.memory_space<smem>>
      %53 = vector.broadcast %52 : i32 to vector<4x512xi32>
      %54 = arith.cmpi eq, %16, %53 : vector<4x512xi32>
      %cst_22 = arith.constant 0.000000e+00 : f32
      %55 = vector.broadcast %cst_22 : f32 to vector<4x512xf32>
      %56 = arith.select %54, %15, %55 : vector<4x512xi1>, vector<4x512xf32>
      %cst_23 = arith.constant dense<0.000000e+00> : vector<512xf32>
      %57 = vector.multi_reduction <add>, %56, %cst_23 [0] : vector<4x512xf32> to vector<512xf32>
      %58 = vector.shape_cast %57 : vector<512xf32> to vector<1x512xf32>
      %c6 = arith.constant 6 : index
      %59 = memref.load %arg1[%c6] : memref<8xi32, #tpu.memory_space<smem>>
      %60 = vector.broadcast %59 : i32 to vector<4x512xi32>
      %61 = arith.cmpi eq, %16, %60 : vector<4x512xi32>
      %cst_24 = arith.constant 0.000000e+00 : f32
      %62 = vector.broadcast %cst_24 : f32 to vector<4x512xf32>
      %63 = arith.select %61, %15, %62 : vector<4x512xi1>, vector<4x512xf32>
      %cst_25 = arith.constant dense<0.000000e+00> : vector<512xf32>
      %64 = vector.multi_reduction <add>, %63, %cst_25 [0] : vector<4x512xf32> to vector<512xf32>
      %65 = vector.shape_cast %64 : vector<512xf32> to vector<1x512xf32>
      %c7 = arith.constant 7 : index
      %66 = memref.load %arg1[%c7] : memref<8xi32, #tpu.memory_space<smem>>
      %67 = vector.broadcast %66 : i32 to vector<4x512xi32>
      %68 = arith.cmpi eq, %16, %67 : vector<4x512xi32>
      %cst_26 = arith.constant 0.000000e+00 : f32
      %69 = vector.broadcast %cst_26 : f32 to vector<4x512xf32>
      %70 = arith.select %68, %15, %69 : vector<4x512xi1>, vector<4x512xf32>
      %cst_27 = arith.constant dense<0.000000e+00> : vector<512xf32>
      %71 = vector.multi_reduction <add>, %70, %cst_27 [0] : vector<4x512xf32> to vector<512xf32>
      %72 = vector.shape_cast %71 : vector<512xf32> to vector<1x512xf32>
      %73 = tpu.concatenate %23, %30, %37, %44, %51, %58, %65, %72 in 0 : vector<1x512xf32>, vector<1x512xf32>, vector<1x512xf32>, vector<1x512xf32>, vector<1x512xf32>, vector<1x512xf32>, vector<1x512xf32>, vector<1x512xf32> -> vector<8x512xf32>
      %c0_28 = arith.constant 0 : index
      %c0_29 = arith.constant 0 : index
      %74 = vector.load %arg9[%c0_28, %c0_29] : memref<8x512xf32, #tpu.memory_space<vmem>>, vector<8x512xf32>
      %c0_30 = arith.constant 0 : index
      %c0_31 = arith.constant 0 : index
      %75 = vector.load %arg4[%c0_30, %c0_31] : memref<1x512xf32, #tpu.memory_space<vmem>>, vector<1x512xf32>
      %76 = vector.broadcast %75 : vector<1x512xf32> to vector<8x512xf32>
      %77 = arith.mulf %74, %76 : vector<8x512xf32>
      %78 = arith.addf %77, %73 : vector<8x512xf32>
      %c0_32 = arith.constant 0 : index
      %c0_33 = arith.constant 0 : index
      %79 = vector.load %arg7[%c0_32, %c0_33] : memref<8x512xf32, #tpu.memory_space<vmem>>, vector<8x512xf32>
      tpu.vector_store %arg7[%c0_32, %c0_33], %78 {strides = array<i32>} : memref<8x512xf32, #tpu.memory_space<vmem>>, vector<8x512xf32>,
      %c0_34 = arith.constant 0 : index
      %c0_35 = arith.constant 0 : index
      %80 = vector.load %arg6[%c0_34, %c0_35] : memref<512x256xf32, #tpu.memory_space<vmem>>, vector<512x256xf32>
      %cst_36 = arith.constant dense<0.000000e+00> : vector<8x256xf32>
      %81 = tpu.matmul %78, %80, %cst_36 {dimension_numbers = #tpu.dot_dimension_numbers<[1], [0], [0], [1], [0, 0, 1, 1], [], []>} : vector<8x512xf32>, vector<512x256xf32>, vector<8x256xf32> -> vector<8x256xf32>
      %c0_37 = arith.constant 0 : index
      %c0_38 = arith.constant 0 : index
      %82 = vector.load %arg8[%c0_37, %c0_38] : memref<8x256xf32, #tpu.memory_space<vmem>>, vector<8x256xf32>
      tpu.vector_store %arg8[%c0_37, %c0_38], %81 {strides = array<i32>} : memref<8x256xf32, #tpu.memory_space<vmem>>, vector<8x256xf32>,
    } else {
    }
    return
  }
  func.func @transform_0(%arg0: i32, %arg1: memref<8xi32, #tpu.memory_space<smem>>) -> (i32, i32) {
    %c0_i32 = arith.constant 0 : i32
    %c0_i32_0 = arith.constant 0 : i32
    return %c0_i32, %arg0 : i32, i32
  }
  func.func @transform_1(%arg0: i32, %arg1: memref<8xi32, #tpu.memory_space<smem>>) -> (i32, i32) {
    %c0_i32 = arith.constant 0 : i32
    %c0_i32_0 = arith.constant 0 : i32
    return %arg0, %c0_i32 : i32, i32
  }
  func.func @transform_2(%arg0: i32, %arg1: memref<8xi32, #tpu.memory_space<smem>>) -> (i32, i32) {
    %c0_i32 = arith.constant 0 : i32
    %c0_i32_0 = arith.constant 0 : i32
    %c0_i32_1 = arith.constant 0 : i32
    return %c0_i32, %c0_i32_0 : i32, i32
  }
  func.func @transform_3(%arg0: i32, %arg1: memref<8xi32, #tpu.memory_space<smem>>) -> (i32, i32) {
    %c0_i32 = arith.constant 0 : i32
    %c0_i32_0 = arith.constant 0 : i32
    %c0_i32_1 = arith.constant 0 : i32
    return %c0_i32, %c0_i32_0 : i32, i32
  }
  func.func @transform_4(%arg0: i32, %arg1: memref<8xi32, #tpu.memory_space<smem>>) -> (i32, i32) {
    %c0_i32 = arith.constant 0 : i32
    %c0_i32_0 = arith.constant 0 : i32
    %c0_i32_1 = arith.constant 0 : i32
    return %c0_i32, %c0_i32_0 : i32, i32
  }
  func.func @transform_5(%arg0: i32, %arg1: memref<8xi32, #tpu.memory_space<smem>>) -> (i32, i32) {
    %c0_i32 = arith.constant 0 : i32
    %c0_i32_0 = arith.constant 0 : i32
    %c0_i32_1 = arith.constant 0 : i32
    return %c0_i32, %c0_i32_0 : i32, i32
  }
  func.func @transform_6(%arg0: i32, %arg1: memref<8xi32, #tpu.memory_space<smem>>) -> (i32, i32) {
    %c0_i32 = arith.constant 0 : i32
    %c0_i32_0 = arith.constant 0 : i32
    %c0_i32_1 = arith.constant 0 : i32
    return %c0_i32, %c0_i32_0 : i32, i32
  }
}

</mosaic_0001>

<bundles_post_ra>
// kernel: _fwd.1
= control target key start
LH: loop header
LB: loop body
LE: loop exit
PB: predicated region body
PF: predicated region fallthrough
CT: control target
= control target key end

     0   :  { %s3142_s0 = inlined_call_operand.vmem [shape: s32[8], index: 0, kind: input, shape index: {}]   ;;  %s3143_s1 = inlined_call_operand.vmem [shape: f32[8,3072], index: 1, kind: input, shape index: {}]   ;;  %s3144_s2 = inlined_call_operand.hbm [shape: s8[3072,512], index: 2, kind: input, shape index: {}]   ;;  %s3145_s3 = inlined_call_operand.hbm [shape: f32[1,512], index: 3, kind: input, shape index: {}]   ;;  %s3146_s4 = inlined_call_operand.hbm [shape: f32[4,512], index: 4, kind: input, shape index: {}]   ;;  %s3147_s5 = inlined_call_operand.hbm [shape: f32[512,256], index: 5, kind: input, shape index: {}]   ;;  %s3148_s6 = inlined_call_operand.vmem [shape: f32[8,512], index: 6, kind: output, shape index: {0}]   ;;  %s3149_s7 = inlined_call_operand.vmem [shape: f32[8,256], index: 7, kind: output, shape index: {1}]  }
   0x1   :  { %s13_s26 = sshll.u32 %s3142_s0, 4  ;;  %s14_s26 = int_to_ptr.vmem [resolvable:$true] %s13_s26 }
   0x2   :  { %s2037_s27 = scalar_lea.vmem %s14_s26, 16  ;;  %p2042_p1 = scmp.lt.s32.totalorder %s14_s26, %s14_s26 }
   0x3   :  { %p2038_p0 = scmp.ne.s32.totalorder %s14_s26, %s2037_s27  ;;  %p2043_p2 = scmp.lt.s32.totalorder %s2037_s27, %s2037_s27 }
   0x5   :  { %p2044_p3 = por %p2043_p2, %p2042_p1 }
   0x7   :  { %p2045_p4 = pnand %p2044_p3, %p2038_p0 }
   0x9   :  { %2048 = shalt.err (!%p2045_p4)  }
   0xa   :  { %s2209_s28 = smov [#allocation4]  }
   0xb   :  { %16 = dma.vmem_to_smem %s14_s26, 16, %s2209_s28, [#allocation3] }
   0xc   :  { %2179 = dma.done.wait [#allocation3], 16 }
   0xd   :  { %2180 = vsyncadd [#allocation3], 4294967280 }
   0xe   :  { %18 = sfence }
   0xf   :  { %19 = vsyncpa [#allocation6], 0 }
  0x10   :  { %21 = vsyncpa [#allocation6 + $0x1], 0 }
  0x11   :  { %22 = vsyncpa [#allocation8], 0 }
  0x12   :  { %23 = vsyncpa [#allocation11], 0  ;;  %s2262_s29 = smov 0   ;;  %s2264_s0 = smov 0  }
  0x13   :  { %s2266_s30 = smov 0   ;;  %s2268_s8 = smov 0  }
  0x14 LB: > { %s2281_s9 = sadd.s32 4294967295, %s2207_s8   ;;  %p75_p5 = scmp.ne.s32.totalorder %s2199_s0, %s2195_s29  ;;  %s2207_s8 = sphi %s2268_s8, %s3232_s8   ;;  %s2203_s30 = sphi %s2266_s30, %s3231_s30   ;;  %s2199_s0 = sphi %s2264_s0, %s3230_s0   ;;  %s2195_s29 = sphi %s2262_s29, %s3229_s29  }
  0x15   : > { %p3150_p6 = scmp.eq.s32.totalorder %s2281_s9, 0  ;;  %p1800_p7 = scmp.ge.s32.totalorder %s2207_s8, 1 }
  0x16   : > { %p191_p8 = scmp.lt.s32.totalorder %s2207_s8, 4  ;;  %s2210_s12 = smov [#allocation7]  }
  0x17   : > { %p2290_p10 = por %p3150_p6, %p75_p5  ;;  %s204_s13 = sshll.u32 %s2210_s12, 4  ;;  %s205_s13 = int_to_ptr.vmem [resolvable:$true] %s204_s13 }
  0x18   : > { %p2294_p11 = pnand %p1800_p7, %p191_p8  ;;  %s2211_s14 = smov [#allocation9]  }
  0x19   : > { %s3166_s10 = scalar_select %p2290_p10, 1, 0 }
  0x1a   : > { %s3167_s11 = scalar_select %p2294_p11, 1, 0 }
  0x1b   : > { %p1973_p12 = pneg %p2294_p11  ;;  %s215_s15 = sshll.u32 %s2211_s14, 4  ;;  %s2306_s15 = int_to_ptr.vmem [resolvable:$true] %s215_s15 }
  0x1c   : > { %s2212_s17 = smov [#allocation10]   ;;  %s2049_s21 = scalar_lea.hbm %s3145_s3, 64 }
  0x1d   : > { %p2302_p13 = pnand %p1973_p12, %p3150_p6  ;;  %s225_s18 = sshll.u32 %s2212_s17, 4  ;;  %s2308_s18 = int_to_ptr.vmem [resolvable:$true] %s225_s18 }
  0x1e   : > { %p2050_p0 = scmp.ne.s32.totalorder %s3145_s3, %s2049_s21  ;;  %p2056_p4 = scmp.lt.u32.totalorder %s2049_s21, %s3145_s3 }
  0x1f   : > { %p2318_p1 = pneg %p2302_p13 }
  0x21   : > { %p2052_p2 = pnand %p2318_p1, %p2050_p0 }
  0x23   : > { %p2053_p3 = pneg %p2052_p2 }
  0x25   : > { %p2058_p5 = pnand %p2056_p4, %p2053_p3 }
  0x27   : > { %2061 = shalt.err (!%p2058_p5)
}
  0x28   : > { %s2062_s27 = scalar_lea.vmem %s205_s13, 64  ;;  %p2070_p9 = scmp.lt.s32.totalorder %s205_s13, %s205_s13 }
  0x29   : > { %p2063_p7 = scmp.ne.s32.totalorder %s205_s13, %s2062_s27  ;;  %p2071_p6 = scmp.lt.s32.totalorder %s2062_s27, %s2062_s27 }
  0x2b   : > { %p2065_p8 = pnand %p2063_p7, %p2318_p1  ;;  %p2072_p10 = por %p2071_p6, %p2070_p9 }
  0x2d   : > { %p2066_p12 = pneg %p2065_p8 }
  0x2f   : > { %p2073_p11 = pnand %p2072_p10, %p2066_p12 }
  0x31   : > { %2076 = shalt.err (!%p2073_p11)
}
  0x32   : > { %1976 = dma.hbm_to_vmem [thread:$0]  (!%p2302_p13), %s3145_s3, 64, %s205_s13, [#allocation8]  }
  0x33   : > { %s2077_s17 = scalar_lea.hbm %s3146_s4, 256 }
  0x34   : > { %p2078_p0 = scmp.ne.s32.totalorder %s3146_s4, %s2077_s17  ;;  %p2084_p9 = scmp.lt.u32.totalorder %s2077_s17, %s3146_s4 }
  0x36   : > { %p2080_p2 = pnand %p2078_p0, %p2318_p1 }
  0x38   : > { %p2081_p6 = pneg %p2080_p2 }
  0x3a   : > { %p2086_p10 = pnand %p2084_p9, %p2081_p6 }
  0x3c   : > { %2089 = shalt.err (!%p2086_p10)
}
  0x3d   : > { %s2090_s13 = scalar_lea.vmem %s2306_s15, 256  ;;  %p2098_p5 = scmp.lt.s32.totalorder %s2306_s15, %s2306_s15 }
  0x3e   : > { %p2091_p11 = scmp.ne.s32.totalorder %s2306_s15, %s2090_s13  ;;  %p2099_p7 = scmp.lt.s32.totalorder %s2090_s13, %s2090_s13 }
  0x40   : > { %p2093_p3 = pnand %p2091_p11, %p2318_p1  ;;  %p2100_p8 = por %p2099_p7, %p2098_p5 }
  0x42   : > { %p2094_p4 = pneg %p2093_p3 }
  0x44   : > { %p2101_p12 = pnand %p2100_p8, %p2094_p4 }
  0x46   : > { %2104 = shalt.err (!%p2101_p12)
}
  0x47   : > { %1979 = dma.hbm_to_vmem [thread:$0]  (!%p2302_p13), %s3146_s4, 256, %s2306_s15, [#allocation8]  }
  0x48   : > { %s2105_s28 = scalar_lea.hbm %s3147_s5, 16384 }
  0x49   : > { %p2106_p0 = scmp.ne.s32.totalorder %s3147_s5, %s2105_s28  ;;  %p2112_p9 = scmp.lt.u32.totalorder %s2105_s28, %s3147_s5 }
  0x4b   : > { %p2108_p2 = pnand %p2106_p0, %p2318_p1 }
  0x4d   : > { %p2109_p6 = pneg %p2108_p2 }
  0x4f   : > { %p2114_p10 = pnand %p2112_p9, %p2109_p6 }
  0x51   : > { %2117 = shalt.err (!%p2114_p10)
}
  0x52   : > { %s2118_s15 = scalar_lea.vmem %s2308_s18, 16384  ;;  %p2126_p5 = scmp.lt.s32.totalorder %s2308_s18, %s2308_s18 }
  0x53   : > { %p2119_p11 = scmp.ne.s32.totalorder %s2308_s18, %s2118_s15  ;;  %p2127_p7 = scmp.lt.s32.totalorder %s2118_s15, %s2118_s15 }
  0x55   : > { %p2121_p3 = pnand %p2119_p11, %p2318_p1  ;;  %p2128_p8 = por %p2127_p7, %p2126_p5 }
  0x57   : > { %p2122_p4 = pneg %p2121_p3 }
  0x59   : > { %p2129_p12 = pnand %p2128_p8, %p2122_p4 }
  0x5b   : > { %2132 = shalt.err (!%p2129_p12)
}
  0x5c   : > { %s2213_s19 = smov 256   ;;  %s2214_s24 = smov 16  }
  0x5d   : > { %1982 = dma.hbm_to_vmem [thread:$0]  (!%p2302_p13), %s3147_s5, 16384, %s2308_s18, [#allocation11], %s2213_s19, %s2213_s19, %s2214_s24  }
  0x5e   : > { %s2381_s22 = sadd.s32 1, %s2207_s8   ;;  %s62_s23 = sadd.s32 1, %s2203_s30 }
  0x5f   : > { %s59_s13 = ssub.s32 %s2207_s8, %s2381_s22  ;;  %p69_p0 = scmp.ne.s32.totalorder %s2203_s30, %s2199_s0 }
  0x60   : > { %p60_p1 = scmp.eq.s32.totalorder %s59_s13, 0  ;;  %p70_p2 = scmp.eq.s32.totalorder %s2207_s8, 0 }
  0x61   : > { %p1990_p6 = scmp.lt.s32.totalorder %s2207_s8, 3  ;;  %s248_s26 = sand.u32 1, %s2203_s30  }
  0x62   : > { %s2391_s25 = scalar_select %p60_p1, %s2203_s30, %s62_s23  }
  0x63   : > { %p71_p9 = por %p70_p2, %p69_p0  ;;  %s1805_s27 = sshll.u32 %s248_s26, 10 }
  0x64   : > { %s1828_s28 = sshll.u32 %s2207_s8, 14  ;;  %s252_s18 = scalar_lea.vmem [#allocation5], %s1805_s27 }
  0x65   : > { %s2398_s12 = scalar_lea.hbm %s3144_s2, %s1828_s28  ;;  %s260_s14 = sshll.u32 %s252_s18, 4  ;;  %s2400_s14 = int_to_ptr.vmem [resolvable:$true] %s260_s14 }
  0x66   : > { %p2402_p13 = pnand %p1990_p6, %p71_p9  ;;  %s2406_s8 = scalar_lea.sflag [#allocation6], %s248_s26 }
  0x67   : > { %s2133_s15 = scalar_lea.hbm %s2398_s12, 16384  ;;  %s2138_s20 = scalar_lea.hbm %s3144_s2, 49152 }
  0x68   : > { %p2134_p10 = scmp.ne.s32.totalorder %s2398_s12, %s2133_s15  ;;  %p2135_p11 = pneg %p2402_p13 }
  0x69   : > { %p2139_p5 = scmp.lt.u32.totalorder %s2398_s12, %s3144_s2  ;;  %p2140_p7 = scmp.lt.u32.totalorder %s2138_s20, %s2133_s15 }
  0x6a   : > { %p2136_p3 = pnand %p2135_p11, %p2134_p10  ;;  %p2142_p12 = scmp.lt.u32.totalorder %s2133_s15, %s2398_s12 }
  0x6b   : > { %p2141_p8 = por %p2140_p7, %p2139_p5 }
  0x6c   : > { %p2137_p4 = pneg %p2136_p3 }
  0x6d   : > { %p2143_p1 = por %p2142_p12, %p2141_p8 }
  0x6f   : > { %p2144_p0 = pnand %p2143_p1, %p2137_p4 }
  0x71   : > { %2147 = shalt.err (!%p2144_p0)
}
  0x72   : > { %s2148_s23 = scalar_lea.vmem %s2400_s14, 16384  ;;  %s2215_s26 = smov [#allocation5]  }
  0x73   : > { %p2149_p2 = scmp.ne.s32.totalorder %s2400_s14, %s2148_s23  ;;  %s2153_s27 = sshll.u32 %s2215_s26, 4  ;;  %s2154_s27 = int_to_ptr.vmem [resolvable:$false] %s2153_s27 }
  0x74   : > { %s2155_s28 = scalar_lea.vmem %s2154_s27, 32768  ;;  %p2156_p10 = scmp.lt.s32.totalorder %s2400_s14, %s2154_s27 }
  0x75   : > { %p2151_p6 = pnand %p2149_p2, %p2135_p11  ;;  %p2157_p3 = scmp.lt.s32.totalorder %s2155_s28, %s2148_s23 }
  0x77   : > { %p2152_p9 = pneg %p2151_p6  ;;  %p2158_p5 = por %p2157_p3, %p2156_p10 }
  0x79   : > { %p2159_p7 = pnand %p2158_p5, %p2152_p9 }
  0x7b   : > { %2162 = shalt.err (!%p2159_p7)
}
  0x7c   : > { %s2216_s16 = smov 512   ;;  %s2217_s29 = smov 32  }
  0x7d   : > { %1986 = dma.hbm_to_vmem [thread:$0]  (!%p2402_p13), %s2398_s12, 16384, %s2400_s14, %s2406_s8, %s2216_s16, %s2216_s16, %s2217_s29  }
  0x7e   : > { %p3171_p11 = scmp.ne.s32.totalorder %s3167_s11, 0 }
  0x7f   : > { %s274_s18 = sand.u32 (!%p3171_p11), 1, %s2199_s0   ;;  %p3172_p4 = scmp.ne.s32.totalorder (!%p3171_p11), %s3166_s10, 0 }
  0x80   : > { %272 = sbr.rel (%p3171_p11) target bundleno = 977 (0x3d1), region = 40  ;;  %s1810_s15 = sshll.u32 (!%p3171_p11), %s274_s18, 10 }
  0x81   : > { %s275_s19 = scalar_lea.sflag (!%p3171_p11), [#allocation6], %s274_s18  ;;  %s2437_s24 = scalar_lea.vmem (!%p3171_p11), [#allocation5], %s1810_s15 }
  0x87   : > { %2182 = dma.done.wait (%p3172_p4), %s275_s19, 16384  }
  0x88   : > { %2184 = vsyncadd (%p3172_p4), %s275_s19, 4294950912  ;;  %p3173_p8 = scmp.eq.s32.totalorder %s2281_s9, 0 }
  0x8a   : > { %2186 = dma.done.wait (%p3173_p8), [#allocation8], 320   ;;  %p3174_p13 = pmov %p3173_p8 }
  0x8b   : > { %p3175_p12 = pmov %p3173_p8 }
  0x8c   : > { %2188 = vsyncadd (%p3174_p13), [#allocation8], 4294966976 }
  0x8d   : > { %2190 = dma.done.wait (%p3175_p12), [#allocation11], 16384   ;;  %p3176_p1 = pmov %p3173_p8 }
  0x8e   : > { %s1814_s11 = sshll.u32 %s2281_s9, 3  ;;  %p3177_p2 = scmp.ne.s32.totalorder %s2281_s9, 0 }
  0x8f   : > { %2192 = vsyncadd (%p3176_p1), [#allocation11], 4294950912  ;;  %p320_p0 = scmp.lt.s32.totalorder %s1814_s11, 23  ;;  %v2218_v0 = vmov (!%p3177_p2), 0.0  }
  0x90   : > { %329 = sbr.rel (%p3177_p2) target bundleno = 151 (0x97), region = 60  ;;  %330 = vst [vmem:[#allocation2] sm:$0xff] (!%p3177_p2), %v2218_v0  ;;  %331 = vst [vmem:[#allocation2 + $0x8] sm:$0xff] (!%p3177_p2), %v2218_v0 }
  0x91   : > { %s3234_s11 = smov (!%p320_p0, %s1814_s11), 23  ;;  %332 = vst [vmem:[#allocation2 + $0x10] sm:$0xff] (!%p3177_p2), %v2218_v0  ;;  %333 = vst [vmem:[#allocation2 + $0x18] sm:$0xff] (!%p3177_p2), %v2218_v0 }
  0x92   : > { %s1815_s12 = sshll.u32 %s3234_s11, 3 }
  0x93   : > { %s2455_s17 = scalar_lea.vmem %s3143_s1, %s1815_s12 }
  0x97 PF: > { %v335_v1 = vld [vmem:[%s2437_s24 + $0x8] sm:$0xff]  ;;  %v334_v3 = vld [vmem:[%s2437_s24] sm:$0xff]  ;;  %v725_v32 = vld [vmem:[%s2455_s17 + $0x18] sm:$0xff]  ;;  %p1817_p6 = scmp.ne.s32.totalorder %s2281_s9, 2 }
  0x98   : > { %v367_v2 = vld [vmem:[%s2437_s24 + $0x108] sm:$0xff]  ;;  %v463_v4 = vunpack.c.l.s8.bf16 %v335_v1  ;;  %v467_v5 = vunpack.c.h.s8.bf16 %v335_v1  ;;  %v366_v8 = vld [vmem:[%s2437_s24 + $0x100] sm:$0xff]  ;;  %v462_v9 = vunpack.c.l.s8.bf16 %v334_v3  ;;  %v466_v13 = vunpack.c.h.s8.bf16 %v334_v3 }
  0x99   : > { %v527_v6 = vunpack.c.l.s8.bf16 %v367_v2  ;;  %v531_v7 = vunpack.c.h.s8.bf16 %v367_v2  ;;  %v526_v10 = vunpack.c.l.s8.bf16 %v366_v8  ;;  %v339_v11 = vld [vmem:[%s2437_s24 + $0x28] sm:$0xff]  ;;  %v530_v14 = vunpack.c.h.s8.bf16 %v366_v8  ;;  %v338_v17 = vld [vmem:[%s2437_s24 + $0x20] sm:$0xff] }
  0x9a   : > { %v371_v12 = vld [vmem:[%s2437_s24 + $0x128] sm:$0xff]  ;;  %738 = vmatprep.subr.bf16.mxu0 %v463_v4  ;;  %v471_v15 = vunpack.c.l.s8.bf16 %v339_v11  ;;  %v370_v18 = vld [vmem:[%s2437_s24 + $0x120] sm:$0xff]  ;;  %v470_v19 = vunpack.c.l.s8.bf16 %v338_v17  ;;  %v475_v21 = vunpack.c.h.s8.bf16 %v339_v11  ;;  %v474_v25 = vunpack.c.h.s8.bf16 %v338_v17 }
  0x9b   : > { %779 = vmatprep.subr.bf16.mxu1 %v527_v6  ;;  %739 = vmatpush1.bf16.msra.mxu0 %v462_v9  ;;  %v535_v16 = vunpack.c.l.s8.bf16 %v371_v12  ;;  %v534_v20 = vunpack.c.l.s8.bf16 %v370_v18  ;;  %v539_v22 = vunpack.c.h.s8.bf16 %v371_v12  ;;  %v343_v23 = vld [vmem:[%s2437_s24 + $0x48] sm:$0xff]  ;;  %v538_v26 = vunpack.c.h.s8.bf16 %v370_v18  ;;  %v342_v29 = vld [vmem:[%s2437_s24 + $0x40] sm:$0xff] }
  0x9c   : > { %780 = vmatpush1.bf16.msra.mxu1 %v526_v10  ;;  %740 = vmatprep.subr.bf16.mxu0 %v467_v5  ;;  %v375_v24 = vld [vmem:[%s2437_s24 + $0x148] sm:$0xff]  ;;  %v479_v27 = vunpack.c.l.s8.bf16 %v343_v23  ;;  %v374_v30 = vld [vmem:[%s2437_s24 + $0x140] sm:$0xff]  ;;  %v478_v33 = vunpack.c.l.s8.bf16 %v342_v29  ;;  %v483_v35 = vunpack.c.h.s8.bf16 %v343_v23  ;;  %v2475_v38 = vpack.c.bf16 %v725_v32, %v725_v32 }
  0x9d   : > { %781 = vmatprep.subr.bf16.mxu1 %v531_v7  ;;  %v543_v28 = vunpack.c.l.s8.bf16 %v375_v24  ;;  %v723_v31 = vld [vmem:[%s2455_s17 + $0x8] sm:$0xff]  ;;  %v542_v34 = vunpack.c.l.s8.bf16 %v374_v30  ;;  %v547_v36 = vunpack.c.h.s8.bf16 %v375_v24  ;;  %v482_v41 = vunpack.c.h.s8.bf16 %v342_v29  ;;  %v346_v45 = vld [vmem:[%s2437_s24 + $0x60] sm:$0xff] }
  0x9e   : > { %v2473_v37 = vpack.c.bf16 %v723_v31, %v723_v31  ;;  %v347_v39 = vld [vmem:[%s2437_s24 + $0x68] sm:$0xff]  ;;  %811 = vmatprep.mubr.bf16.mxu1 %v2475_v38  ;;  %v546_v42 = vunpack.c.h.s8.bf16 %v374_v30  ;;  %v378_v46 = vld [vmem:[%s2437_s24 + $0x160] sm:$0xff]  ;;  %v486_v47 = vunpack.c.l.s8.bf16 %v346_v45  ;;  %v490_v53 = vunpack.c.h.s8.bf16 %v346_v45 }
  0x9f   : > { %741 = vmatpush1.bf16.msra.mxu0 %v466_v13  ;;  %v379_v40 = vld [vmem:[%s2437_s24 + $0x168] sm:$0xff]  ;;  %v487_v43 = vunpack.c.l.s8.bf16 %v347_v39  ;;  %v550_v48 = vunpack.c.l.s8.bf16 %v378_v46  ;;  %v491_v49 = vunpack.c.h.s8.bf16 %v347_v39  ;;  %v554_v54 = vunpack.c.h.s8.bf16 %v378_v46  ;;  %v350_v57 = vld [vmem:[%s2437_s24 + $0x80] sm:$0xff] }
  0xa0   : > { %782 = vmatpush1.bf16.msra.mxu1 %v530_v14  ;;  %742 = vmatprep.subr.bf16.mxu0 %v471_v15  ;;  %v551_v44 = vunpack.c.l.s8.bf16 %v379_v40  ;;  %v555_v50 = vunpack.c.h.s8.bf16 %v379_v40  ;;  %v351_v51 = vld [vmem:[%s2437_s24 + $0x88] sm:$0xff]  ;;  %v382_v58 = vld [vmem:[%s2437_s24 + $0x180] sm:$0xff]  ;;  %v494_v59 = vunpack.c.l.s8.bf16 %v350_v57  ;;  %v498_v1 = vunpack.c.h.s8.bf16 %v350_v57 }
  0xa1   : > { %783 = vmatprep.subr.bf16.mxu1 %v535_v16  ;;  %770 = vmatprep.mubr.bf16.mxu0 %v2473_v37  ;;  %v383_v52 = vld [vmem:[%s2437_s24 + $0x188] sm:$0xff]  ;;  %v495_v55 = vunpack.c.l.s8.bf16 %v351_v51  ;;  %v558_v60 = vunpack.c.l.s8.bf16 %v382_v58  ;;  %v499_v61 = vunpack.c.h.s8.bf16 %v351_v51  ;;  %v562_v2 = vunpack.c.h.s8.bf16 %v382_v58  ;;  %v354_v5 = vld [vmem:[%s2437_s24 + $0xa0] sm:$0xff] }
  0xa2   : > { %v559_v56 = vunpack.c.l.s8.bf16 %v383_v52  ;;  %v563_v62 = vunpack.c.h.s8.bf16 %v383_v52  ;;  %v355_v63 = vld [vmem:[%s2437_s24 + $0xa8] sm:$0xff]  ;;  %v386_v6 = vld [vmem:[%s2437_s24 + $0x1a0] sm:$0xff]  ;;  %v502_v7 = vunpack.c.l.s8.bf16 %v354_v5  ;;  %v506_v13 = vunpack.c.h.s8.bf16 %v354_v5 }
  0xa3   : > { %743 = vmatpush1.bf16.msra.mxu0 %v470_v19  ;;  %v387_v0 = vld [vmem:[%s2437_s24 + $0x1a8] sm:$0xff]  ;;  %v503_v3 = vunpack.c.l.s8.bf16 %v355_v63  ;;  %v566_v8 = vunpack.c.l.s8.bf16 %v386_v6  ;;  %v507_v9 = vunpack.c.h.s8.bf16 %v355_v63  ;;  %v570_v14 = vunpack.c.h.s8.bf16 %v386_v6  ;;  %v358_v17 = vld [vmem:[%s2437_s24 + $0xc0] sm:$0xff] }
  0xa4   : > { %784 = vmatpush1.bf16.msra.mxu1 %v534_v20  ;;  %744 = vmatprep.subr.bf16.mxu0 %v475_v21  ;;  %v567_v4 = vunpack.c.l.s8.bf16 %v387_v0  ;;  %v571_v10 = vunpack.c.h.s8.bf16 %v387_v0  ;;  %v359_v11 = vld [vmem:[%s2437_s24 + $0xc8] sm:$0xff]  ;;  %v390_v18 = vld [vmem:[%s2437_s24 + $0x1c0] sm:$0xff]  ;;  %v510_v19 = vunpack.c.l.s8.bf16 %v358_v17 }
  0xa5   : > { %785 = vmatprep.subr.bf16.mxu1 %v539_v22  ;;  %v391_v12 = vld [vmem:[%s2437_s24 + $0x1c8] sm:$0xff]  ;;  %v511_v15 = vunpack.c.l.s8.bf16 %v359_v11  ;;  %v574_v20 = vunpack.c.l.s8.bf16 %v390_v18  ;;  %v515_v21 = vunpack.c.h.s8.bf16 %v359_v11  ;;  %v362_v29 = vld [vmem:[%s2437_s24 + $0xe0] sm:$0xff] }
  0xa6   : > { %v575_v16 = vunpack.c.l.s8.bf16 %v391_v12  ;;  %v579_v22 = vunpack.c.h.s8.bf16 %v391_v12  ;;  %v363_v23 = vld [vmem:[%s2437_s24 + $0xe8] sm:$0xff]  ;;  %v394_v30 = vld [vmem:[%s2437_s24 + $0x1e0] sm:$0xff]  ;;  %v518_v31 = vunpack.c.l.s8.bf16 %v362_v29  ;;  %v522_v39 = vunpack.c.h.s8.bf16 %v362_v29 }
  0xa7   : > { %745 = vmatpush1.bf16.msra.mxu0 %v474_v25  ;;  %v395_v24 = vld [vmem:[%s2437_s24 + $0x1e8] sm:$0xff]  ;;  %v514_v25 = vunpack.c.h.s8.bf16 %v358_v17  ;;  %v582_v32 = vunpack.c.l.s8.bf16 %v394_v30  ;;  %v586_v40 = vunpack.c.h.s8.bf16 %v394_v30  ;;  %v398_v45 = vld [vmem:[%s2437_s24 + $0x200] sm:$0xff] }
  0xa8   : > { %786 = vmatpush1.bf16.msra.mxu1 %v538_v26  ;;  %746 = vmatprep.subr.bf16.mxu0 %v479_v27  ;;  %v578_v26 = vunpack.c.h.s8.bf16 %v390_v18  ;;  %v519_v27 = vunpack.c.l.s8.bf16 %v363_v23  ;;  %v430_v46 = vld [vmem:[%s2437_s24 + $0x300] sm:$0xff]  ;;  %v590_v51 = vunpack.c.l.s8.bf16 %v398_v45  ;;  %v407_v5 = vld [vmem:[%s2437_s24 + $0x248] sm:$0xff] }
  0xa9   : > { %787 = vmatprep.subr.bf16.mxu1 %v543_v28  ;;  %v583_v28 = vunpack.c.l.s8.bf16 %v395_v24  ;;  %v654_v52 = vunpack.c.l.s8.bf16 %v430_v46  ;;  %v402_v63 = vld [vmem:[%s2437_s24 + $0x220] sm:$0xff]  ;;  %v439_v6 = vld [vmem:[%s2437_s24 + $0x348] sm:$0xff] }
  0xaa   : > { %v434_v0 = vld [vmem:[%s2437_s24 + $0x320] sm:$0xff]  ;;  %v411_v17 = vld [vmem:[%s2437_s24 + $0x268] sm:$0xff] }
  0xab   : > { %747 = vmatpush1.bf16.msra.mxu0 %v478_v33  ;;  %v523_v33 = vunpack.c.h.s8.bf16 %v363_v23  ;;  %v406_v11 = vld [vmem:[%s2437_s24 + $0x240] sm:$0xff]  ;;  %v443_v18 = vld [vmem:[%s2437_s24 + $0x368] sm:$0xff] }
  0xac   : > { %788 = vmatpush1.bf16.msra.mxu1 %v542_v34  ;;  %748 = vmatprep.subr.bf16.mxu0 %v483_v35  ;;  %v587_v34 = vunpack.c.h.s8.bf16 %v395_v24  ;;  %v399_v35 = vld [vmem:[%s2437_s24 + $0x208] sm:$0xff]  ;;  %v438_v12 = vld [vmem:[%s2437_s24 + $0x340] sm:$0xff] }
  0xad   : > { %789 = vmatprep.subr.bf16.mxu1 %v547_v36  ;;  %v431_v36 = vld [vmem:[%s2437_s24 + $0x308] sm:$0xff]  ;;  %v410_v23 = vld [vmem:[%s2437_s24 + $0x260] sm:$0xff] }
  0xae   : > { %v442_v24 = vld [vmem:[%s2437_s24 + $0x360] sm:$0xff]  ;;  %v415_v29 = vld [vmem:[%s2437_s24 + $0x288] sm:$0xff] }
  0xaf   : > { %749 = vmatpush1.bf16.msra.mxu0 %v482_v41  ;;  %v722_v41 = vld [vmem:[%s2455_s17] sm:$0xff]  ;;  %v447_v30 = vld [vmem:[%s2437_s24 + $0x388] sm:$0xff] }
  0xb0   : > { %790 = vmatpush1.bf16.msra.mxu1 %v546_v42  ;;  %750 = vmatprep.subr.bf16.mxu0 %v487_v43  ;;  %v724_v42 = vld [vmem:[%s2455_s17 + $0x10] sm:$0xff]  ;;  %v591_v43 = vunpack.c.l.s8.bf16 %v399_v35 }
  0xb1   : > { %791 = vmatprep.subr.bf16.mxu1 %v551_v44  ;;  %v655_v44 = vunpack.c.l.s8.bf16 %v431_v36 }
  0xb3   : > { %751 = vmatpush1.bf16.msra.mxu0 %v486_v47  ;;  %v2505_v47 = vpack.c.bf16 %v722_v41, %v722_v41  ;;  %v627_v41 = vunpack.c.h.s8.bf16 %v415_v29 }
  0xb4   : > { %792 = vmatpush1.bf16.msra.mxu1 %v550_v48  ;;  %752 = vmatprep.subr.bf16.mxu0 %v491_v49  ;;  %v2507_v48 = vpack.c.bf16 %v724_v42, %v724_v42  ;;  %v727_v49 = vld [vmem:[%s2455_s17 + $0x28] sm:$0xff]  ;;  %v691_v42 = vunpack.c.h.s8.bf16 %v447_v30 }
  0xb5   : > { %793 = vmatprep.subr.bf16.mxu1 %v555_v50  ;;  %v729_v50 = vld [vmem:[%s2455_s17 + $0x38] sm:$0xff]  ;;  %v2513_v57 = vpack.c.bf16 %v727_v49, %v727_v49 }
  0xb6   : > { %v2515_v58 = vpack.c.bf16 %v729_v50, %v729_v50 }
  0xb7   : > { %753 = vmatpush1.bf16.msra.mxu0 %v490_v53  ;;  %v595_v53 = vunpack.c.h.s8.bf16 %v399_v35  ;;  %v414_v35 = vld [vmem:[%s2437_s24 + $0x280] sm:$0xff] }
  0xb8   : > { %794 = vmatpush1.bf16.msra.mxu1 %v554_v54  ;;  %754 = vmatprep.subr.bf16.mxu0 %v495_v55  ;;  %v659_v54 = vunpack.c.h.s8.bf16 %v431_v36  ;;  %v403_v55 = vld [vmem:[%s2437_s24 + $0x228] sm:$0xff]  ;;  %v446_v36 = vld [vmem:[%s2437_s24 + $0x380] sm:$0xff] }
  0xb9   : > { %795 = vmatprep.subr.bf16.mxu1 %v559_v56  ;;  %v435_v56 = vld [vmem:[%s2437_s24 + $0x328] sm:$0xff] }
  0xbb   : > { %755 = vmatpush1.bf16.msra.mxu0 %v494_v59  ;;  %v594_v59 = vunpack.c.h.s8.bf16 %v398_v45  ;;  %v626_v45 = vunpack.c.h.s8.bf16 %v414_v35 }
  0xbc   : > { %796 = vmatpush1.bf16.msra.mxu1 %v558_v60  ;;  %756 = vmatprep.subr.bf16.mxu0 %v499_v61  ;;  %v658_v60 = vunpack.c.h.s8.bf16 %v430_v46  ;;  %v599_v61 = vunpack.c.l.s8.bf16 %v403_v55  ;;  %v690_v46 = vunpack.c.h.s8.bf16 %v446_v36 }
  0xbd   : > { %797 = vmatprep.subr.bf16.mxu1 %v563_v62  ;;  %v663_v62 = vunpack.c.l.s8.bf16 %v435_v56 }
  0xbf   : > { %757 = vmatpush1.bf16.msra.mxu0 %v498_v1  ;;  %v598_v1 = vunpack.c.l.s8.bf16 %v402_v63 }
  0xc0   : > { %798 = vmatpush1.bf16.msra.mxu1 %v562_v2  ;;  %758 = vmatprep.subr.bf16.mxu0 %v503_v3  ;;  %v662_v2 = vunpack.c.l.s8.bf16 %v434_v0  ;;  %v603_v3 = vunpack.c.h.s8.bf16 %v403_v55 }
  0xc1   : > { %799 = vmatprep.subr.bf16.mxu1 %v567_v4  ;;  %v667_v4 = vunpack.c.h.s8.bf16 %v435_v56 }
  0xc3   : > { %759 = vmatpush1.bf16.msra.mxu0 %v502_v7  ;;  %v602_v7 = vunpack.c.h.s8.bf16 %v402_v63 }
  0xc4   : > { %800 = vmatpush1.bf16.msra.mxu1 %v566_v8  ;;  %760 = vmatprep.subr.bf16.mxu0 %v507_v9  ;;  %v666_v8 = vunpack.c.h.s8.bf16 %v434_v0  ;;  %v607_v9 = vunpack.c.l.s8.bf16 %v407_v5 }
  0xc5   : > { %801 = vmatprep.subr.bf16.mxu1 %v571_v10  ;;  %v671_v10 = vunpack.c.l.s8.bf16 %v439_v6 }
  0xc7   : > { %761 = vmatpush1.bf16.msra.mxu0 %v506_v13  ;;  %v606_v13 = vunpack.c.l.s8.bf16 %v406_v11 }
  0xc8   : > { %802 = vmatpush1.bf16.msra.mxu1 %v570_v14  ;;  %762 = vmatprep.subr.bf16.mxu0 %v511_v15  ;;  %v670_v14 = vunpack.c.l.s8.bf16 %v438_v12  ;;  %v611_v15 = vunpack.c.h.s8.bf16 %v407_v5 }
  0xc9   : > { %803 = vmatprep.subr.bf16.mxu1 %v575_v16  ;;  %v675_v16 = vunpack.c.h.s8.bf16 %v439_v6 }
  0xcb   : > { %763 = vmatpush1.bf16.msra.mxu0 %v510_v19  ;;  %v610_v19 = vunpack.c.h.s8.bf16 %v406_v11 }
  0xcc   : > { %804 = vmatpush1.bf16.msra.mxu1 %v574_v20  ;;  %764 = vmatprep.subr.bf16.mxu0 %v515_v21  ;;  %v674_v20 = vunpack.c.h.s8.bf16 %v438_v12  ;;  %v615_v21 = vunpack.c.l.s8.bf16 %v411_v17 }
  0xcd   : > { %805 = vmatprep.subr.bf16.mxu1 %v579_v22  ;;  %v679_v22 = vunpack.c.l.s8.bf16 %v443_v18 }
  0xcf   : > { %765 = vmatpush1.bf16.msra.mxu0 %v514_v25  ;;  %v614_v25 = vunpack.c.l.s8.bf16 %v410_v23 }
  0xd0   : > { %806 = vmatpush1.bf16.msra.mxu1 %v578_v26  ;;  %766 = vmatprep.subr.bf16.mxu0 %v519_v27  ;;  %v678_v26 = vunpack.c.l.s8.bf16 %v442_v24  ;;  %v619_v27 = vunpack.c.h.s8.bf16 %v411_v17 }
  0xd1   : > { %807 = vmatprep.subr.bf16.mxu1 %v583_v28  ;;  %v683_v28 = vunpack.c.h.s8.bf16 %v443_v18 }
  0xd3   : > { %767 = vmatpush1.bf16.msra.mxu0 %v518_v31  ;;  %v618_v31 = vunpack.c.h.s8.bf16 %v410_v23  ;;  %v726_v23 = vld [vmem:[%s2455_s17 + $0x20] sm:$0xff] }
  0xd4   : > { %808 = vmatpush1.bf16.msra.mxu1 %v582_v32  ;;  %768 = vmatprep.subr.bf16.mxu0 %v523_v33  ;;  %v682_v32 = vunpack.c.h.s8.bf16 %v442_v24  ;;  %v623_v33 = vunpack.c.l.s8.bf16 %v415_v29  ;;  %v728_v24 = vld [vmem:[%s2455_s17 + $0x30] sm:$0xff]  ;;  %v2553_v29 = vpack.c.bf16 %v726_v23, %v726_v23  ;;  %v357_v23 = vld [vmem:[%s2437_s24 + $0xb8] sm:$0xff] }
  0xd5   : > { %809 = vmatprep.subr.bf16.mxu1 %v587_v34  ;;  %v687_v34 = vunpack.c.l.s8.bf16 %v447_v30  ;;  %v2555_v30 = vpack.c.bf16 %v728_v24, %v728_v24  ;;  %v389_v24 = vld [vmem:[%s2437_s24 + $0x1b8] sm:$0xff] }
  0xd7   : > { %769 = vmatpush1.bf16.msra.mxu0 %v522_v39  ;;  %v622_v39 = vunpack.c.l.s8.bf16 %v414_v35  ;;  %v341_v35 = vld [vmem:[%s2437_s24 + $0x38] sm:$0xff] }
  0xd8   : > { %810 = vmatpush1.bf16.msra.mxu1 %v586_v40  ;;  %820 = vmatprep.subr.bf16.mxu0 %v591_v43  ;;  %v686_v40 = vunpack.c.l.s8.bf16 %v446_v36  ;;  %v419_v43 = vld [vmem:[%s2437_s24 + $0x2a8] sm:$0xff]  ;;  %v373_v36 = vld [vmem:[%s2437_s24 + $0x138] sm:$0xff] }
  0xd9   : > { %861 = vmatprep.subr.bf16.mxu1 %v655_v44  ;;  %v451_v44 = vld [vmem:[%s2437_s24 + $0x3a8] sm:$0xff]  ;;  %v631_v49 = vunpack.c.l.s8.bf16 %v419_v43  ;;  %v635_v55 = vunpack.c.h.s8.bf16 %v419_v43  ;;  %v340_v43 = vld [vmem:[%s2437_s24 + $0x30] sm:$0xff] }
  0xda   : > { %771 = vmatmul.mubr.bf16.vlgmr.msra.gmra.mrb[0].mxu0 %v2505_v47  ;;  %v695_v50 = vunpack.c.l.s8.bf16 %v451_v44  ;;  %v699_v56 = vunpack.c.h.s8.bf16 %v451_v44  ;;  %v372_v44 = vld [vmem:[%s2437_s24 + $0x130] sm:$0xff] }
  0xdb   : > { %812 = vmatmul.mubr.bf16.vlgmr.msra.gmra.mrb[0].mxu1 %v2507_v48  ;;  %821 = vmatpush1.bf16.msra.mxu0 %v590_v51  ;;  %v418_v51 = vld [vmem:[%s2437_s24 + $0x2a0] sm:$0xff] }
  0xdc   : > { %862 = vmatpush1.bf16.msra.mxu1 %v654_v52  ;;  %822 = vmatprep.subr.bf16.mxu0 %v595_v53  ;;  %v450_v52 = vld [vmem:[%s2437_s24 + $0x3a0] sm:$0xff]  ;;  %v630_v53 = vunpack.c.l.s8.bf16 %v418_v51 }
  0xdd   : > { %863 = vmatprep.subr.bf16.mxu1 %v659_v54  ;;  %852 = vmatprep.mubr.bf16.mxu0 %v2513_v57  ;;  %v694_v54 = vunpack.c.l.s8.bf16 %v450_v52 }
  0xde   : > { %893 = vmatprep.mubr.bf16.mxu1 %v2515_v58 }
  0xdf   : > { %823 = vmatpush1.bf16.msra.mxu0 %v594_v59  ;;  %v423_v59 = vld [vmem:[%s2437_s24 + $0x2c8] sm:$0xff] }
  0xe0   : > { %864 = vmatpush1.bf16.msra.mxu1 %v658_v60  ;;  %824 = vmatprep.subr.bf16.mxu0 %v599_v61  ;;  %v455_v60 = vld [vmem:[%s2437_s24 + $0x3c8] sm:$0xff]  ;;  %v634_v61 = vunpack.c.h.s8.bf16 %v418_v51  ;;  %v639_v63 = vunpack.c.l.s8.bf16 %v423_v59  ;;  %v643_v5 = vunpack.c.h.s8.bf16 %v423_v59  ;;  %v345_v51 = vld [vmem:[%s2437_s24 + $0x58] sm:$0xff] }
  0xe1   : > { %865 = vmatprep.subr.bf16.mxu1 %v663_v62  ;;  %v698_v62 = vunpack.c.h.s8.bf16 %v450_v52  ;;  %v703_v0 = vunpack.c.l.s8.bf16 %v455_v60  ;;  %v707_v6 = vunpack.c.h.s8.bf16 %v455_v60  ;;  %v377_v52 = vld [vmem:[%s2437_s24 + $0x158] sm:$0xff] }
  0xe3   : > { %825 = vmatpush1.bf16.msra.mxu0 %v598_v1  ;;  %v422_v1 = vld [vmem:[%s2437_s24 + $0x2c0] sm:$0xff] }
  0xe4   : > { %866 = vmatpush1.bf16.msra.mxu1 %v662_v2  ;;  %826 = vmatprep.subr.bf16.mxu0 %v603_v3  ;;  %v454_v2 = vld [vmem:[%s2437_s24 + $0x3c0] sm:$0xff]  ;;  %v638_v3 = vunpack.c.l.s8.bf16 %v422_v1 }
  0xe5   : > { %867 = vmatprep.subr.bf16.mxu1 %v667_v4  ;;  %v702_v4 = vunpack.c.l.s8.bf16 %v454_v2 }
  0xe7   : > { %827 = vmatpush1.bf16.msra.mxu0 %v602_v7  ;;  %v427_v7 = vld [vmem:[%s2437_s24 + $0x2e8] sm:$0xff] }
  0xe8   : > { %868 = vmatpush1.bf16.msra.mxu1 %v666_v8  ;;  %828 = vmatprep.subr.bf16.mxu0 %v607_v9  ;;  %v459_v8 = vld [vmem:[%s2437_s24 + $0x3e8] sm:$0xff]  ;;  %v642_v9 = vunpack.c.h.s8.bf16 %v422_v1  ;;  %v647_v11 = vunpack.c.l.s8.bf16 %v427_v7  ;;  %v651_v17 = vunpack.c.h.s8.bf16 %v427_v7 }
  0xe9   : > { %869 = vmatprep.subr.bf16.mxu1 %v671_v10  ;;  %v706_v10 = vunpack.c.h.s8.bf16 %v454_v2  ;;  %v711_v12 = vunpack.c.l.s8.bf16 %v459_v8  ;;  %v715_v18 = vunpack.c.h.s8.bf16 %v459_v8 }
  0xeb   : > { %829 = vmatpush1.bf16.msra.mxu0 %v606_v13  ;;  %v426_v13 = vld [vmem:[%s2437_s24 + $0x2e0] sm:$0xff] }
  0xec   : > { %870 = vmatpush1.bf16.msra.mxu1 %v670_v14  ;;  %830 = vmatprep.subr.bf16.mxu0 %v611_v15  ;;  %v458_v14 = vld [vmem:[%s2437_s24 + $0x3e0] sm:$0xff]  ;;  %v646_v15 = vunpack.c.l.s8.bf16 %v426_v13 }
  0xed   : > { %871 = vmatprep.subr.bf16.mxu1 %v675_v16  ;;  %v710_v16 = vunpack.c.l.s8.bf16 %v458_v14 }
  0xef   : > { %831 = vmatpush1.bf16.msra.mxu0 %v610_v19  ;;  %v337_v19 = vld [vmem:[%s2437_s24 + $0x18] sm:$0xff] }
  0xf0   : > { %872 = vmatpush1.bf16.msra.mxu1 %v674_v20  ;;  %832 = vmatprep.subr.bf16.mxu0 %v615_v21  ;;  %v369_v20 = vld [vmem:[%s2437_s24 + $0x118] sm:$0xff]  ;;  %v650_v21 = vunpack.c.h.s8.bf16 %v426_v13 }
  0xf1   : > { %873 = vmatprep.subr.bf16.mxu1 %v679_v22  ;;  %v714_v22 = vunpack.c.h.s8.bf16 %v458_v14 }
  0xf3   : > { %833 = vmatpush1.bf16.msra.mxu0 %v614_v25  ;;  %v465_v25 = vunpack.c.l.s8.bf16 %v337_v19 }
  0xf4   : > { %874 = vmatpush1.bf16.msra.mxu1 %v678_v26  ;;  %834 = vmatprep.subr.bf16.mxu0 %v619_v27  ;;  %v529_v26 = vunpack.c.l.s8.bf16 %v369_v20  ;;  %v336_v27 = vld [vmem:[%s2437_s24 + $0x10] sm:$0xff] }
  0xf5   : > { %875 = vmatprep.subr.bf16.mxu1 %v683_v28  ;;  %v368_v28 = vld [vmem:[%s2437_s24 + $0x110] sm:$0xff] }
  0xf7   : > { %835 = vmatpush1.bf16.msra.mxu0 %v618_v31  ;;  %v464_v31 = vunpack.c.l.s8.bf16 %v336_v27 }
  0xf8   : > { %876 = vmatpush1.bf16.msra.mxu1 %v682_v32  ;;  %836 = vmatprep.subr.bf16.mxu0 %v623_v33  ;;  %v528_v32 = vunpack.c.l.s8.bf16 %v368_v28  ;;  %v469_v33 = vunpack.c.h.s8.bf16 %v337_v19 }
  0xf9   : > { %877 = vmatprep.subr.bf16.mxu1 %v687_v34  ;;  %v533_v34 = vunpack.c.h.s8.bf16 %v369_v20 }
  0xfb   : > { %837 = vmatpush1.bf16.msra.mxu0 %v622_v39  ;;  %v468_v39 = vunpack.c.h.s8.bf16 %v336_v27  ;;  %v505_v27 = vunpack.c.l.s8.bf16 %v357_v23 }
  0xfc   : > { %878 = vmatpush1.bf16.msra.mxu1 %v686_v40  ;;  %838 = vmatprep.subr.bf16.mxu0 %v627_v41  ;;  %v532_v40 = vunpack.c.h.s8.bf16 %v368_v28  ;;  %v473_v41 = vunpack.c.l.s8.bf16 %v341_v35  ;;  %v569_v28 = vunpack.c.l.s8.bf16 %v389_v24 }
  0xfd   : > { %879 = vmatprep.subr.bf16.mxu1 %v691_v42  ;;  %v537_v42 = vunpack.c.l.s8.bf16 %v373_v36 }
  0xff   : > { %839 = vmatpush1.bf16.msra.mxu0 %v626_v45  ;;  %v472_v45 = vunpack.c.l.s8.bf16 %v340_v43 }
 0x100   : > { %880 = vmatpush1.bf16.msra.mxu1 %v690_v46  ;;  %840 = vmatprep.subr.bf16.mxu0 %v631_v49  ;;  %v536_v46 = vunpack.c.l.s8.bf16 %v372_v44  ;;  %v477_v49 = vunpack.c.h.s8.bf16 %v341_v35  ;;  %v509_v35 = vunpack.c.h.s8.bf16 %v357_v23  ;;  %v409_v23 = vld [vmem:[%s2437_s24 + $0x258] sm:$0xff] }
 0x101   : > { %881 = vmatprep.subr.bf16.mxu1 %v695_v50  ;;  %v541_v50 = vunpack.c.h.s8.bf16 %v373_v36  ;;  %v573_v36 = vunpack.c.h.s8.bf16 %v389_v24  ;;  %v441_v24 = vld [vmem:[%s2437_s24 + $0x358] sm:$0xff] }
 0x103   : > { %841 = vmatpush1.bf16.msra.mxu0 %v630_v53  ;;  %v476_v53 = vunpack.c.h.s8.bf16 %v340_v43 }
 0x104   : > { %882 = vmatpush1.bf16.msra.mxu1 %v694_v54  ;;  %842 = vmatprep.subr.bf16.mxu0 %v635_v55  ;;  %v540_v54 = vunpack.c.h.s8.bf16 %v372_v44  ;;  %v344_v55 = vld [vmem:[%s2437_s24 + $0x50] sm:$0xff] }
 0x105   : > { %883 = vmatprep.subr.bf16.mxu1 %v699_v56  ;;  %v376_v56 = vld [vmem:[%s2437_s24 + $0x150] sm:$0xff]  ;;  %v480_v59 = vunpack.c.l.s8.bf16 %v344_v55  ;;  %v484_v1 = vunpack.c.h.s8.bf16 %v344_v55 }
 0x106   : > { %v544_v60 = vunpack.c.l.s8.bf16 %v376_v56  ;;  %v548_v2 = vunpack.c.h.s8.bf16 %v376_v56 }
 0x107   : > { %843 = vmatpush1.bf16.msra.mxu0 %v634_v61  ;;  %v485_v61 = vunpack.c.h.s8.bf16 %v345_v51 }
 0x108   : > { %884 = vmatpush1.bf16.msra.mxu1 %v698_v62  ;;  %844 = vmatprep.subr.bf16.mxu0 %v639_v63  ;;  %v549_v62 = vunpack.c.h.s8.bf16 %v377_v52  ;;  %v349_v63 = vld [vmem:[%s2437_s24 + $0x78] sm:$0xff] }
 0x109   : > { %885 = vmatprep.subr.bf16.mxu1 %v703_v0  ;;  %v381_v0 = vld [vmem:[%s2437_s24 + $0x178] sm:$0xff] }
 0x10b   : > { %845 = vmatpush1.bf16.msra.mxu0 %v638_v3  ;;  %v489_v3 = vunpack.c.l.s8.bf16 %v349_v63 }
 0x10c   : > { %886 = vmatpush1.bf16.msra.mxu1 %v702_v4  ;;  %846 = vmatprep.subr.bf16.mxu0 %v643_v5  ;;  %v553_v4 = vunpack.c.l.s8.bf16 %v381_v0  ;;  %v348_v5 = vld [vmem:[%s2437_s24 + $0x70] sm:$0xff] }
 0x10d   : > { %887 = vmatprep.subr.bf16.mxu1 %v707_v6  ;;  %v380_v6 = vld [vmem:[%s2437_s24 + $0x170] sm:$0xff]  ;;  %v488_v7 = vunpack.c.l.s8.bf16 %v348_v5  ;;  %v492_v13 = vunpack.c.h.s8.bf16 %v348_v5 }
 0x10e   : > { %v552_v8 = vunpack.c.l.s8.bf16 %v380_v6  ;;  %v556_v14 = vunpack.c.h.s8.bf16 %v380_v6 }
 0x10f   : > { %847 = vmatpush1.bf16.msra.mxu0 %v642_v9  ;;  %v493_v9 = vunpack.c.h.s8.bf16 %v349_v63 }
 0x110   : > { %888 = vmatpush1.bf16.msra.mxu1 %v706_v10  ;;  %848 = vmatprep.subr.bf16.mxu0 %v647_v11  ;;  %v557_v10 = vunpack.c.h.s8.bf16 %v381_v0  ;;  %v353_v11 = vld [vmem:[%s2437_s24 + $0x98] sm:$0xff] }
 0x111   : > { %889 = vmatprep.subr.bf16.mxu1 %v711_v12  ;;  %v385_v12 = vld [vmem:[%s2437_s24 + $0x198] sm:$0xff] }
 0x113   : > { %849 = vmatpush1.bf16.msra.mxu0 %v646_v15  ;;  %v497_v15 = vunpack.c.l.s8.bf16 %v353_v11 }
 0x114   : > { %890 = vmatpush1.bf16.msra.mxu1 %v710_v16  ;;  %850 = vmatprep.subr.bf16.mxu0 %v651_v17  ;;  %v561_v16 = vunpack.c.l.s8.bf16 %v385_v12  ;;  %v352_v17 = vld [vmem:[%s2437_s24 + $0x90] sm:$0xff] }
 0x115   : > { %891 = vmatprep.subr.bf16.mxu1 %v715_v18  ;;  %v384_v18 = vld [vmem:[%s2437_s24 + $0x190] sm:$0xff]  ;;  %v496_v19 = vunpack.c.l.s8.bf16 %v352_v17 }
 0x116   : > { %v560_v20 = vunpack.c.l.s8.bf16 %v384_v18 }
 0x117   : > { %851 = vmatpush1.bf16.msra.mxu0 %v650_v21  ;;  %v501_v21 = vunpack.c.h.s8.bf16 %v353_v11 }
 0x118   : > { %892 = vmatpush1.bf16.msra.mxu1 %v714_v22  ;;  %902 = vmatprep.subr.bf16.mxu0 %v465_v25  ;;  %v565_v22 = vunpack.c.h.s8.bf16 %v385_v12  ;;  %v500_v25 = vunpack.c.h.s8.bf16 %v352_v17 }
 0x119   : > { %943 = vmatprep.subr.bf16.mxu1 %v529_v26  ;;  %v564_v26 = vunpack.c.h.s8.bf16 %v384_v18 }
 0x11a   : > { %853 = vmatmul.mubr.bf16.vlgmr.msra.gmra.mrb[4].mxu0 %v2553_v29 }
 0x11b   : > { %894 = vmatmul.mubr.bf16.vlgmr.msra.gmra.mrb[4].mxu1 %v2555_v30  ;;  %903 = vmatpush1.bf16.msra.mxu0 %v464_v31  ;;  %v356_v31 = vld [vmem:[%s2437_s24 + $0xb0] sm:$0xff] }
 0x11c   : > { %944 = vmatpush1.bf16.msra.mxu1 %v528_v32  ;;  %904 = vmatprep.subr.bf16.mxu0 %v469_v33  ;;  %v388_v32 = vld [vmem:[%s2437_s24 + $0x1b0] sm:$0xff]  ;;  %v504_v33 = vunpack.c.l.s8.bf16 %v356_v31 }
 0x11d   : > { %945 = vmatprep.subr.bf16.mxu1 %v533_v34  ;;  %934 = vmatprep.mubr.bf16.mxu0 %v2473_v37  ;;  %v481_v37 = vunpack.c.l.s8.bf16 %v345_v51  ;;  %v568_v34 = vunpack.c.l.s8.bf16 %v388_v32 }
 0x11e   : > { %975 = vmatprep.mubr.bf16.mxu1 %v2475_v38  ;;  %v545_v38 = vunpack.c.l.s8.bf16 %v377_v52 }
 0x11f   : > { %905 = vmatpush1.bf16.msra.mxu0 %v468_v39  ;;  %v361_v39 = vld [vmem:[%s2437_s24 + $0xd8] sm:$0xff] }
 0x120   : > { %946 = vmatpush1.bf16.msra.mxu1 %v532_v40  ;;  %906 = vmatprep.subr.bf16.mxu0 %v473_v41  ;;  %v393_v40 = vld [vmem:[%s2437_s24 + $0x1d8] sm:$0xff]  ;;  %v508_v41 = vunpack.c.h.s8.bf16 %v356_v31  ;;  %v513_v43 = vunpack.c.l.s8.bf16 %v361_v39  ;;  %v517_v51 = vunpack.c.h.s8.bf16 %v361_v39 }
 0x121   : > { %947 = vmatprep.subr.bf16.mxu1 %v537_v42  ;;  %v572_v42 = vunpack.c.h.s8.bf16 %v388_v32  ;;  %v577_v44 = vunpack.c.l.s8.bf16 %v393_v40  ;;  %v581_v52 = vunpack.c.h.s8.bf16 %v393_v40 }
 0x123   : > { %907 = vmatpush1.bf16.msra.mxu0 %v472_v45  ;;  %v360_v45 = vld [vmem:[%s2437_s24 + $0xd0] sm:$0xff] }
 0x124   : > { %948 = vmatpush1.bf16.msra.mxu1 %v536_v46  ;;  %908 = vmatprep.subr.bf16.mxu0 %v477_v49  ;;  %v392_v46 = vld [vmem:[%s2437_s24 + $0x1d0] sm:$0xff]  ;;  %v512_v49 = vunpack.c.l.s8.bf16 %v360_v45 }
 0x125   : > { %949 = vmatprep.subr.bf16.mxu1 %v541_v50  ;;  %v576_v50 = vunpack.c.l.s8.bf16 %v392_v46 }
 0x127   : > { %909 = vmatpush1.bf16.msra.mxu0 %v476_v53  ;;  %v365_v53 = vld [vmem:[%s2437_s24 + $0xf8] sm:$0xff] }
 0x128   : > { %950 = vmatpush1.bf16.msra.mxu1 %v540_v54  ;;  %910 = vmatprep.subr.bf16.mxu0 %v481_v37  ;;  %v397_v54 = vld [vmem:[%s2437_s24 + $0x1f8] sm:$0xff]  ;;  %v516_v37 = vunpack.c.h.s8.bf16 %v360_v45  ;;  %v521_v55 = vunpack.c.l.s8.bf16 %v365_v53  ;;  %v525_v63 = vunpack.c.h.s8.bf16 %v365_v53 }
 0x129   : > { %951 = vmatprep.subr.bf16.mxu1 %v545_v38  ;;  %v580_v38 = vunpack.c.h.s8.bf16 %v392_v46  ;;  %v585_v56 = vunpack.c.l.s8.bf16 %v397_v54  ;;  %v589_v0 = vunpack.c.h.s8.bf16 %v397_v54 }
 0x12b   : > { %911 = vmatpush1.bf16.msra.mxu0 %v480_v59  ;;  %v364_v59 = vld [vmem:[%s2437_s24 + $0xf0] sm:$0xff] }
 0x12c   : > { %952 = vmatpush1.bf16.msra.mxu1 %v544_v60  ;;  %912 = vmatprep.subr.bf16.mxu0 %v485_v61  ;;  %v396_v60 = vld [vmem:[%s2437_s24 + $0x1f0] sm:$0xff]  ;;  %v520_v61 = vunpack.c.l.s8.bf16 %v364_v59 }
 0x12d   : > { %953 = vmatprep.subr.bf16.mxu1 %v549_v62  ;;  %v584_v62 = vunpack.c.l.s8.bf16 %v396_v60 }
 0x12f   : > { %913 = vmatpush1.bf16.msra.mxu0 %v484_v1  ;;  %v401_v1 = vld [vmem:[%s2437_s24 + $0x218] sm:$0xff] }
 0x130   : > { %954 = vmatpush1.bf16.msra.mxu1 %v548_v2  ;;  %914 = vmatprep.subr.bf16.mxu0 %v489_v3  ;;  %v433_v2 = vld [vmem:[%s2437_s24 + $0x318] sm:$0xff]  ;;  %v524_v3 = vunpack.c.h.s8.bf16 %v364_v59  ;;  %v593_v5 = vunpack.c.l.s8.bf16 %v401_v1  ;;  %v597_v11 = vunpack.c.h.s8.bf16 %v401_v1 }
 0x131   : > { %955 = vmatprep.subr.bf16.mxu1 %v553_v4  ;;  %v588_v4 = vunpack.c.h.s8.bf16 %v396_v60  ;;  %v657_v6 = vunpack.c.l.s8.bf16 %v433_v2  ;;  %v661_v12 = vunpack.c.h.s8.bf16 %v433_v2 }
 0x133   : > { %915 = vmatpush1.bf16.msra.mxu0 %v488_v7  ;;  %v400_v7 = vld [vmem:[%s2437_s24 + $0x210] sm:$0xff] }
 0x134   : > { %956 = vmatpush1.bf16.msra.mxu1 %v552_v8  ;;  %916 = vmatprep.subr.bf16.mxu0 %v493_v9  ;;  %v432_v8 = vld [vmem:[%s2437_s24 + $0x310] sm:$0xff]  ;;  %v592_v9 = vunpack.c.l.s8.bf16 %v400_v7 }
 0x135   : > { %957 = vmatprep.subr.bf16.mxu1 %v557_v10  ;;  %v656_v10 = vunpack.c.l.s8.bf16 %v432_v8 }
 0x137   : > { %917 = vmatpush1.bf16.msra.mxu0 %v492_v13  ;;  %v405_v13 = vld [vmem:[%s2437_s24 + $0x238] sm:$0xff] }
 0x138   : > { %958 = vmatpush1.bf16.msra.mxu1 %v556_v14  ;;  %918 = vmatprep.subr.bf16.mxu0 %v497_v15  ;;  %v437_v14 = vld [vmem:[%s2437_s24 + $0x338] sm:$0xff]  ;;  %v596_v15 = vunpack.c.h.s8.bf16 %v400_v7  ;;  %v601_v17 = vunpack.c.l.s8.bf16 %v405_v13 }
 0x139   : > { %959 = vmatprep.subr.bf16.mxu1 %v561_v16  ;;  %v660_v16 = vunpack.c.h.s8.bf16 %v432_v8  ;;  %v665_v18 = vunpack.c.l.s8.bf16 %v437_v14 }
 0x13b   : > { %919 = vmatpush1.bf16.msra.mxu0 %v496_v19  ;;  %v404_v19 = vld [vmem:[%s2437_s24 + $0x230] sm:$0xff] }
 0x13c   : > { %960 = vmatpush1.bf16.msra.mxu1 %v560_v20  ;;  %920 = vmatprep.subr.bf16.mxu0 %v501_v21  ;;  %v436_v20 = vld [vmem:[%s2437_s24 + $0x330] sm:$0xff]  ;;  %v605_v21 = vunpack.c.h.s8.bf16 %v405_v13 }
 0x13d   : > { %961 = vmatprep.subr.bf16.mxu1 %v565_v22  ;;  %v669_v22 = vunpack.c.h.s8.bf16 %v437_v14 }
 0x13f   : > { %921 = vmatpush1.bf16.msra.mxu0 %v500_v25  ;;  %v604_v25 = vunpack.c.h.s8.bf16 %v404_v19 }
 0x140   : > { %962 = vmatpush1.bf16.msra.mxu1 %v564_v26  ;;  %922 = vmatprep.subr.bf16.mxu0 %v505_v27  ;;  %v668_v26 = vunpack.c.h.s8.bf16 %v436_v20  ;;  %v408_v27 = vld [vmem:[%s2437_s24 + $0x250] sm:$0xff] }
 0x141   : > { %963 = vmatprep.subr.bf16.mxu1 %v569_v28  ;;  %v440_v28 = vld [vmem:[%s2437_s24 + $0x350] sm:$0xff]  ;;  %v608_v31 = vunpack.c.l.s8.bf16 %v408_v27  ;;  %v612_v39 = vunpack.c.h.s8.bf16 %v408_v27 }
 0x142   : > { %v672_v32 = vunpack.c.l.s8.bf16 %v440_v28  ;;  %v676_v40 = vunpack.c.h.s8.bf16 %v440_v28 }
 0x143   : > { %923 = vmatpush1.bf16.msra.mxu0 %v504_v33  ;;  %v613_v33 = vunpack.c.h.s8.bf16 %v409_v23 }
 0x144   : > { %964 = vmatpush1.bf16.msra.mxu1 %v568_v34  ;;  %924 = vmatprep.subr.bf16.mxu0 %v509_v35  ;;  %v677_v34 = vunpack.c.h.s8.bf16 %v441_v24  ;;  %v413_v35 = vld [vmem:[%s2437_s24 + $0x278] sm:$0xff] }
 0x145   : > { %965 = vmatprep.subr.bf16.mxu1 %v573_v36  ;;  %v445_v36 = vld [vmem:[%s2437_s24 + $0x378] sm:$0xff] }
 0x147   : > { %925 = vmatpush1.bf16.msra.mxu0 %v508_v41  ;;  %v617_v41 = vunpack.c.l.s8.bf16 %v413_v35 }
 0x148   : > { %966 = vmatpush1.bf16.msra.mxu1 %v572_v42  ;;  %926 = vmatprep.subr.bf16.mxu0 %v513_v43  ;;  %v681_v42 = vunpack.c.l.s8.bf16 %v445_v36  ;;  %v412_v43 = vld [vmem:[%s2437_s24 + $0x270] sm:$0xff] }
 0x149   : > { %967 = vmatprep.subr.bf16.mxu1 %v577_v44  ;;  %v444_v44 = vld [vmem:[%s2437_s24 + $0x370] sm:$0xff]  ;;  %v616_v45 = vunpack.c.l.s8.bf16 %v412_v43  ;;  %v620_v53 = vunpack.c.h.s8.bf16 %v412_v43 }
 0x14a   : > { %v680_v46 = vunpack.c.l.s8.bf16 %v444_v44  ;;  %v684_v54 = vunpack.c.h.s8.bf16 %v444_v44 }
 0x14b   : > { %927 = vmatpush1.bf16.msra.mxu0 %v512_v49  ;;  %v621_v49 = vunpack.c.h.s8.bf16 %v413_v35 }
 0x14c   : > { %968 = vmatpush1.bf16.msra.mxu1 %v576_v50  ;;  %928 = vmatprep.subr.bf16.mxu0 %v517_v51  ;;  %v685_v50 = vunpack.c.h.s8.bf16 %v445_v36  ;;  %v417_v51 = vld [vmem:[%s2437_s24 + $0x298] sm:$0xff] }
 0x14d   : > { %969 = vmatprep.subr.bf16.mxu1 %v581_v52  ;;  %v449_v52 = vld [vmem:[%s2437_s24 + $0x398] sm:$0xff] }
 0x14f   : > { %929 = vmatpush1.bf16.msra.mxu0 %v516_v37  ;;  %v625_v37 = vunpack.c.l.s8.bf16 %v417_v51 }
 0x150   : > { %970 = vmatpush1.bf16.msra.mxu1 %v580_v38  ;;  %930 = vmatprep.subr.bf16.mxu0 %v521_v55  ;;  %v689_v38 = vunpack.c.l.s8.bf16 %v449_v52  ;;  %v416_v55 = vld [vmem:[%s2437_s24 + $0x290] sm:$0xff] }
 0x151   : > { %971 = vmatprep.subr.bf16.mxu1 %v585_v56  ;;  %v448_v56 = vld [vmem:[%s2437_s24 + $0x390] sm:$0xff]  ;;  %v624_v59 = vunpack.c.l.s8.bf16 %v416_v55  ;;  %v628_v1 = vunpack.c.h.s8.bf16 %v416_v55  ;;  %v719_v55 = vld [vmem:[#allocation2 + $0x8] sm:$0xff] }
 0x152   : > { %v688_v60 = vunpack.c.l.s8.bf16 %v448_v56  ;;  %v692_v2 = vunpack.c.h.s8.bf16 %v448_v56 }
 0x153   : > { %931 = vmatpush1.bf16.msra.mxu0 %v520_v61  ;;  %v629_v61 = vunpack.c.h.s8.bf16 %v417_v51 }
 0x154   : > { %972 = vmatpush1.bf16.msra.mxu1 %v584_v62  ;;  %932 = vmatprep.subr.bf16.mxu0 %v525_v63  ;;  %v693_v62 = vunpack.c.h.s8.bf16 %v449_v52  ;;  %v421_v63 = vld [vmem:[%s2437_s24 + $0x2b8] sm:$0xff] }
 0x155   : > { %973 = vmatprep.subr.bf16.mxu1 %v589_v0  ;;  %v453_v0 = vld [vmem:[%s2437_s24 + $0x3b8] sm:$0xff] }
 0x157   : > { %933 = vmatpush1.bf16.msra.mxu0 %v524_v3  ;;  %v633_v3 = vunpack.c.l.s8.bf16 %v421_v63 }
 0x158   : > { %974 = vmatpush1.bf16.msra.mxu1 %v588_v4  ;;  %984 = vmatprep.subr.bf16.mxu0 %v593_v5  ;;  %v697_v4 = vunpack.c.l.s8.bf16 %v453_v0  ;;  %v420_v5 = vld [vmem:[%s2437_s24 + $0x2b0] sm:$0xff] }
 0x159   : > { %1025 = vmatprep.subr.bf16.mxu1 %v657_v6  ;;  %v452_v6 = vld [vmem:[%s2437_s24 + $0x3b0] sm:$0xff]  ;;  %v632_v7 = vunpack.c.l.s8.bf16 %v420_v5  ;;  %v636_v13 = vunpack.c.h.s8.bf16 %v420_v5 }
 0x15a   : > { %935 = vmatmul.mubr.bf16.vlgmr.msra.gmra.mrb[8].mxu0 %v2505_v47  ;;  %v600_v47 = vunpack.c.l.s8.bf16 %v404_v19  ;;  %v696_v8 = vunpack.c.l.s8.bf16 %v452_v6  ;;  %v700_v14 = vunpack.c.h.s8.bf16 %v452_v6 }
 0x15b   : > { %976 = vmatmul.mubr.bf16.vlgmr.msra.gmra.mrb[8].mxu1 %v2507_v48  ;;  %985 = vmatpush1.bf16.msra.mxu0 %v592_v9  ;;  %v664_v48 = vunpack.c.l.s8.bf16 %v436_v20  ;;  %v637_v9 = vunpack.c.h.s8.bf16 %v421_v63 }
 0x15c   : > { %1026 = vmatpush1.bf16.msra.mxu1 %v656_v10  ;;  %986 = vmatprep.subr.bf16.mxu0 %v597_v11  ;;  %v701_v10 = vunpack.c.h.s8.bf16 %v453_v0  ;;  %v425_v11 = vld [vmem:[%s2437_s24 + $0x2d8] sm:$0xff] }
 0x15d   : > { %1027 = vmatprep.subr.bf16.mxu1 %v661_v12  ;;  %1016 = vmatprep.mubr.bf16.mxu0 %v2513_v57  ;;  %v609_v57 = vunpack.c.l.s8.bf16 %v409_v23  ;;  %v457_v12 = vld [vmem:[%s2437_s24 + $0x3d8] sm:$0xff] }
 0x15e   : > { %1057 = vmatprep.mubr.bf16.mxu1 %v2515_v58  ;;  %v673_v58 = vunpack.c.l.s8.bf16 %v441_v24 }
 0x15f   : > { %987 = vmatpush1.bf16.msra.mxu0 %v596_v15  ;;  %v641_v15 = vunpack.c.l.s8.bf16 %v425_v11 }
 0x160   : > { %1028 = vmatpush1.bf16.msra.mxu1 %v660_v16  ;;  %988 = vmatprep.subr.bf16.mxu0 %v601_v17  ;;  %v705_v16 = vunpack.c.l.s8.bf16 %v457_v12  ;;  %v424_v17 = vld [vmem:[%s2437_s24 + $0x2d0] sm:$0xff] }
 0x161   : > { %1029 = vmatprep.subr.bf16.mxu1 %v665_v18  ;;  %v456_v18 = vld [vmem:[%s2437_s24 + $0x3d0] sm:$0xff]  ;;  %v640_v19 = vunpack.c.l.s8.bf16 %v424_v17  ;;  %v644_v23 = vunpack.c.h.s8.bf16 %v424_v17 }
 0x162   : > { %v704_v20 = vunpack.c.l.s8.bf16 %v456_v18  ;;  %v708_v24 = vunpack.c.h.s8.bf16 %v456_v18 }
 0x163   : > { %989 = vmatpush1.bf16.msra.mxu0 %v600_v47  ;;  %v645_v47 = vunpack.c.h.s8.bf16 %v425_v11 }
 0x164   : > { %1030 = vmatpush1.bf16.msra.mxu1 %v664_v48  ;;  %990 = vmatprep.subr.bf16.mxu0 %v605_v21  ;;  %v709_v48 = vunpack.c.h.s8.bf16 %v457_v12  ;;  %v429_v21 = vld [vmem:[%s2437_s24 + $0x2f8] sm:$0xff] }
 0x165   : > { %1031 = vmatprep.subr.bf16.mxu1 %v669_v22  ;;  %v461_v22 = vld [vmem:[%s2437_s24 + $0x3f8] sm:$0xff] }
 0x167   : > { %991 = vmatpush1.bf16.msra.mxu0 %v604_v25  ;;  %v649_v25 = vunpack.c.l.s8.bf16 %v429_v21 }
 0x168   : > { %1032 = vmatpush1.bf16.msra.mxu1 %v668_v26  ;;  %992 = vmatprep.subr.bf16.mxu0 %v609_v57  ;;  %v713_v26 = vunpack.c.l.s8.bf16 %v461_v22  ;;  %v428_v57 = vld [vmem:[%s2437_s24 + $0x2f0] sm:$0xff] }
 0x169   : > { %1033 = vmatprep.subr.bf16.mxu1 %v673_v58  ;;  %v460_v58 = vld [vmem:[%s2437_s24 + $0x3f0] sm:$0xff]  ;;  %v648_v27 = vunpack.c.l.s8.bf16 %v428_v57 }
 0x16a   : > { %v712_v28 = vunpack.c.l.s8.bf16 %v460_v58 }
 0x16b   : > { %993 = vmatpush1.bf16.msra.mxu0 %v608_v31  ;;  %v653_v31 = vunpack.c.h.s8.bf16 %v429_v21 }
 0x16c   : > { %1034 = vmatpush1.bf16.msra.mxu1 %v672_v32  ;;  %994 = vmatprep.subr.bf16.mxu0 %v613_v33  ;;  %v717_v32 = vunpack.c.h.s8.bf16 %v461_v22  ;;  %v652_v33 = vunpack.c.h.s8.bf16 %v428_v57 }
 0x16d   : > { %1035 = vmatprep.subr.bf16.mxu1 %v677_v34  ;;  %v716_v34 = vunpack.c.h.s8.bf16 %v460_v58 }
 0x16f   : > { %995 = vmatpush1.bf16.msra.mxu0 %v612_v39 }
 0x170   : > { %1036 = vmatpush1.bf16.msra.mxu1 %v676_v40  ;;  %996 = vmatprep.subr.bf16.mxu0 %v617_v41 }
 0x171   : > { %1037 = vmatprep.subr.bf16.mxu1 %v681_v42 }
 0x173   : > { %997 = vmatpush1.bf16.msra.mxu0 %v616_v45 }
 0x174   : > { %1038 = vmatpush1.bf16.msra.mxu1 %v680_v46  ;;  %998 = vmatprep.subr.bf16.mxu0 %v621_v49 }
 0x175   : > { %1039 = vmatprep.subr.bf16.mxu1 %v685_v50 }
 0x177   : > { %999 = vmatpush1.bf16.msra.mxu0 %v620_v53 }
 0x178   : > { %1040 = vmatpush1.bf16.msra.mxu1 %v684_v54  ;;  %1000 = vmatprep.subr.bf16.mxu0 %v625_v37  ;;  %v718_v54 = vld [vmem:[#allocation2] sm:$0xff] }
 0x179   : > { %1041 = vmatprep.subr.bf16.mxu1 %v689_v38 }
 0x17b   : > { %1001 = vmatpush1.bf16.msra.mxu0 %v624_v59 }
 0x17c   : > { %1042 = vmatpush1.bf16.msra.mxu1 %v688_v60  ;;  %1002 = vmatprep.subr.bf16.mxu0 %v629_v61 }
 0x17d   : > { %1043 = vmatprep.subr.bf16.mxu1 %v693_v62 }
 0x17f   : > { %1003 = vmatpush1.bf16.msra.mxu0 %v628_v1 }
 0x180   : > { %1044 = vmatpush1.bf16.msra.mxu1 %v692_v2  ;;  %1004 = vmatprep.subr.bf16.mxu0 %v633_v3 }
 0x181   : > { %1045 = vmatprep.subr.bf16.mxu1 %v697_v4 }
 0x183   : > { %1005 = vmatpush1.bf16.msra.mxu0 %v632_v7 }
 0x184   : > { %1046 = vmatpush1.bf16.msra.mxu1 %v696_v8  ;;  %1006 = vmatprep.subr.bf16.mxu0 %v637_v9 }
 0x185   : > { %1047 = vmatprep.subr.bf16.mxu1 %v701_v10 }
 0x187   : > { %1007 = vmatpush1.bf16.msra.mxu0 %v636_v13 }
 0x188   : > { %1048 = vmatpush1.bf16.msra.mxu1 %v700_v14  ;;  %1008 = vmatprep.subr.bf16.mxu0 %v641_v15  ;;  %v720_v14 = vld [vmem:[#allocation2 + $0x10] sm:$0xff] }
 0x189   : > { %1049 = vmatprep.subr.bf16.mxu1 %v705_v16 }
 0x18b   : > { %1009 = vmatpush1.bf16.msra.mxu0 %v640_v19  ;;  %v721_v19 = vld [vmem:[#allocation2 + $0x18] sm:$0xff] }
 0x18c   : > { %1050 = vmatpush1.bf16.msra.mxu1 %v704_v20  ;;  %1010 = vmatprep.subr.bf16.mxu0 %v645_v47 }
 0x18d   : > { %1051 = vmatprep.subr.bf16.mxu1 %v709_v48 }
 0x18f   : > { %1011 = vmatpush1.bf16.msra.mxu0 %v644_v23 }
 0x190   : > { %1052 = vmatpush1.bf16.msra.mxu1 %v708_v24  ;;  %1012 = vmatprep.subr.bf16.mxu0 %v649_v25 }
 0x191   : > { %1053 = vmatprep.subr.bf16.mxu1 %v713_v26 }
 0x193   : > { %1013 = vmatpush1.bf16.msra.mxu0 %v648_v27 }
 0x194   : > { %1054 = vmatpush1.bf16.msra.mxu1 %v712_v28  ;;  %1014 = vmatprep.subr.bf16.mxu0 %v653_v31 }
 0x195   : > { %1055 = vmatprep.subr.bf16.mxu1 %v717_v32 }
 0x197   : > { %1015 = vmatpush1.bf16.msra.mxu0 %v652_v33 }
 0x198   : > { %1056 = vmatpush1.bf16.msra.mxu1 %v716_v34 }
 0x19a   : > { %1017 = vmatmul.mubr.bf16.vlgmr.msra.gmra.mrb[12].mxu0 %v2553_v29 }
 0x19b   : > { %1058 = vmatmul.mubr.bf16.vlgmr.msra.gmra.mrb[12].mxu1 %v2555_v30 }
 0x1ad   : > { %v772_v35 = vpop.f32.mrb[0].mxu0 }
 0x1ae   : > { %v813_v36 = vpop.f32.mrb[0].mxu1  ;;  %v774_v40 = vpop.f32.mrb[1].mxu0 }
 0x1af   : > { %v814_v39 = vadd.f32 %v813_v36, %v772_v35  ;;  %v815_v41 = vpop.f32.mrb[1].mxu1  ;;  %v776_v43 = vpop.f32.mrb[2].mxu0 }
 0x1b0   : > { %v816_v42 = vadd.f32 %v815_v41, %v774_v40  ;;  %v817_v44 = vpop.f32.mrb[2].mxu1  ;;  %v777_v45 = vpop.f32.mrb[3].mxu0 }
 0x1b1   : > { %v818_v46 = vpop.f32.mrb[3].mxu1 }
 0x1ed   : > { %v854_v49 = vpop.f32.mrb[4].mxu0 }
 0x1ee   : > { %v895_v50 = vpop.f32.mrb[4].mxu1  ;;  %v855_v51 = vadd.f32 %v854_v49, %v814_v39  ;;  %v856_v52 = vpop.f32.mrb[5].mxu0 }
 0x1ef   : > { %v897_v53 = vpop.f32.mrb[5].mxu1  ;;  %v857_v37 = vadd.f32 %v856_v52, %v816_v42  ;;  %v858_v29 = vpop.f32.mrb[6].mxu0 }
 0x1f0   : > { %v899_v38 = vpop.f32.mrb[6].mxu1  ;;  %v896_v30 = vadd.f32 %v895_v50, %v855_v51  ;;  %v859_v56 = vpop.f32.mrb[7].mxu0 }
 0x1f1   : > { %v900_v59 = vpop.f32.mrb[7].mxu1  ;;  %v898_v60 = vadd.f32 %v897_v53, %v857_v37 }
 0x1f2   : > { %v1066_v61 = vadd.f32 %v896_v30, %v718_v54 }
 0x1f3   : > { %v1067_v62 = vadd.f32 %v898_v60, %v719_v55 }
 0x1f4   : > { %1070 = vst [vmem:[#allocation2] sm:$0xff] %v1066_v61 }
 0x1f5   : > { %1071 = vst [vmem:[#allocation2 + $0x8] sm:$0xff] %v1067_v62 }
 0x22d   : > { %v936_v63 = vpop.f32.mrb[8].mxu0 }
 0x22e   : > { %v977_v0 = vpop.f32.mrb[8].mxu1  ;;  %v938_v2 = vpop.f32.mrb[9].mxu0 }
 0x22f   : > { %v978_v1 = vadd.f32 %v977_v0, %v936_v63  ;;  %v979_v3 = vpop.f32.mrb[9].mxu1  ;;  %v940_v5 = vpop.f32.mrb[10].mxu0 }
 0x230   : > { %v980_v4 = vadd.f32 %v979_v3, %v938_v2  ;;  %v981_v6 = vpop.f32.mrb[10].mxu1  ;;  %v941_v7 = vpop.f32.mrb[11].mxu0 }
 0x231   : > { %v982_v8 = vpop.f32.mrb[11].mxu1 }
 0x26d   : > { %v1018_v9 = vpop.f32.mrb[12].mxu0 }
 0x26e   : > { %v1059_v10 = vpop.f32.mrb[12].mxu1  ;;  %v1019_v11 = vadd.f32 %v1018_v9, %v978_v1  ;;  %v1020_v12 = vpop.f32.mrb[13].mxu0 }
 0x26f   : > { %v1061_v13 = vpop.f32.mrb[13].mxu1  ;;  %v1021_v15 = vadd.f32 %v1020_v12, %v980_v4  ;;  %v1022_v16 = vpop.f32.mrb[14].mxu0  ;;  %1077 = sbr.rel (%p1817_p6) target bundleno = 977 (0x3d1), region = 64 }
 0x270   : > { %v1063_v17 = vpop.f32.mrb[14].mxu1  ;;  %v1060_v18 = vadd.f32 %v1059_v10, %v1019_v11  ;;  %v1023_v20 = vpop.f32.mrb[15].mxu0 }
 0x271   : > { %v1064_v47 = vpop.f32.mrb[15].mxu1  ;;  %v1062_v48 = vadd.f32 %v1061_v13, %v1021_v15 }
 0x272   : > { %v1068_v21 = vadd.f32 %v1060_v18, %v720_v14 }
 0x273   : > { %v1069_v22 = vadd.f32 %v1062_v48, %v721_v19 }
 0x274   : > { %1072 = vst [vmem:[#allocation2 + $0x10] sm:$0xff] %v1068_v21 }
 0x275   : > { %1073 = vst [vmem:[#allocation2 + $0x18] sm:$0xff] %v1069_v22 }
 0x276   : > { %v1442_v23 = vld [vmem:[#allocation10 + $0x8] sm:$0xff]  ;;  %v1444_v24 = vld [vmem:[#allocation10 + $0x18] sm:$0xff]  ;;  %v1441_v58 = vld [vmem:[#allocation10] sm:$0xff]  ;;  %s2628_s9 = sld [smem:[#allocation4]]  ;;  %s2630_s8 = sld [smem:[#allocation4 + $0x1]]  ;;  %vm1095_vm0 = vcmask 1043456  }
 0x277   : > { %v1506_v25 = vld [vmem:[#allocation10 + $0x208] sm:$0xff]  ;;  %v1829_v26 = vpack.c.bf16 %v1444_v24, %v1442_v23  ;;  %v1508_v57 = vld [vmem:[#allocation10 + $0x218] sm:$0xff]  ;;  %v1443_v27 = vld [vmem:[#allocation10 + $0x10] sm:$0xff]  ;;  %s2632_s20 = sld [smem:[#allocation4 + $0x2]]  ;;  %s2634_s21 = sld [smem:[#allocation4 + $0x3]]  ;;  %vm1369_vm9 = vcmask 1040384  }
 0x278   : > { %v1893_v28 = vpack.c.bf16 %v1508_v57, %v1506_v25  ;;  %v1831_v31 = vpack.c.bf16 %v1443_v27, %v1441_v58  ;;  %v1505_v32 = vld [vmem:[#allocation10 + $0x200] sm:$0xff]  ;;  %v1507_v33 = vld [vmem:[#allocation10 + $0x210] sm:$0xff]  ;;  %v1446_v34 = vld [vmem:[#allocation10 + $0x28] sm:$0xff]  ;;  %s2636_s13 = sld [smem:[#allocation4 + $0x4]]  ;;  %s2638_s23 = sld [smem:[#allocation4 + $0x5]]  ;;  %vm1374_vm10 = vcmask 1041408  }
 0x279   : > { %1830 = vmatprep.subr.bf16.mxu1 %v1829_v26  ;;  %v1895_v35 = vpack.c.bf16 %v1507_v33, %v1505_v32  ;;  %v1448_v36 = vld [vmem:[#allocation10 + $0x38] sm:$0xff]  ;;  %v1510_v39 = vld [vmem:[#allocation10 + $0x228] sm:$0xff]  ;;  %v1445_v43 = vld [vmem:[#allocation10 + $0x20] sm:$0xff]  ;;  %s2640_s26 = sld [smem:[#allocation4 + $0x6]]  ;;  %s2642_s27 = sld [smem:[#allocation4 + $0x7]]  ;;  %vm1379_vm11 = vcmask 1042432  }
 0x27a   : > { %v1512_v40 = vld [vmem:[#allocation10 + $0x238] sm:$0xff]  ;;  %1894 = vmatprep.subr.bf16.mxu0 %v1893_v28  ;;  %1832 = vmatpush1.bf16.msra.mxu1 %v1831_v31  ;;  %v1833_v41 = vpack.c.bf16 %v1448_v36, %v1446_v34  ;;  %v1447_v44 = vld [vmem:[#allocation10 + $0x30] sm:$0xff]  ;;  %v1509_v45 = vld [vmem:[#allocation10 + $0x220] sm:$0xff]  ;;  %vm1388_vm12 = vcmask 1044480   ;;  %vm1393_vm13 = vcmask 1045504   ;;  %vm1398_vm14 = vcmask 1046528  }
 0x27b   : > { %v1897_v42 = vpack.c.bf16 %v1512_v40, %v1510_v39  ;;  %1896 = vmatpush1.bf16.msra.mxu0 %v1895_v35  ;;  %v1835_v46 = vpack.c.bf16 %v1447_v44, %v1445_v43  ;;  %v1511_v49 = vld [vmem:[#allocation10 + $0x230] sm:$0xff]  ;;  %v1450_v50 = vld [vmem:[#allocation10 + $0x48] sm:$0xff]  ;;  %v1452_v51 = vld [vmem:[#allocation10 + $0x58] sm:$0xff] }
 0x27c   : > { %1834 = vmatprep.subr.bf16.mxu1 %v1833_v41  ;;  %v1899_v52 = vpack.c.bf16 %v1511_v49, %v1509_v45  ;;  %v1837_v53 = vpack.c.bf16 %v1452_v51, %v1450_v50  ;;  %v1514_v54 = vld [vmem:[#allocation10 + $0x248] sm:$0xff]  ;;  %v1516_v37 = vld [vmem:[#allocation10 + $0x258] sm:$0xff]  ;;  %v1449_v29 = vld [vmem:[#allocation10 + $0x40] sm:$0xff] }
 0x27d   : > { %1898 = vmatprep.subr.bf16.mxu0 %v1897_v42  ;;  %v1901_v38 = vpack.c.bf16 %v1516_v37, %v1514_v54  ;;  %v1451_v30 = vld [vmem:[#allocation10 + $0x50] sm:$0xff]  ;;  %v1513_v55 = vld [vmem:[#allocation10 + $0x240] sm:$0xff]  ;;  %v1454_v60 = vld [vmem:[#allocation10 + $0x68] sm:$0xff] }
 0x27e   : > { %v1515_v56 = vld [vmem:[#allocation10 + $0x250] sm:$0xff]  ;;  %1836 = vmatpush1.bf16.msra.mxu1 %v1835_v46  ;;  %v1839_v59 = vpack.c.bf16 %v1451_v30, %v1449_v29  ;;  %v1456_v61 = vld [vmem:[#allocation10 + $0x78] sm:$0xff]  ;;  %v1518_v62 = vld [vmem:[#allocation10 + $0x268] sm:$0xff] }
 0x27f   : > { %1900 = vmatpush1.bf16.msra.mxu0 %v1899_v52  ;;  %1838 = vmatprep.subr.bf16.mxu1 %v1837_v53  ;;  %v1903_v63 = vpack.c.bf16 %v1515_v56, %v1513_v55  ;;  %v1841_v0 = vpack.c.bf16 %v1456_v61, %v1454_v60  ;;  %v1520_v1 = vld [vmem:[#allocation10 + $0x278] sm:$0xff]  ;;  %v1453_v2 = vld [vmem:[#allocation10 + $0x60] sm:$0xff]  ;;  %v1455_v3 = vld [vmem:[#allocation10 + $0x70] sm:$0xff] }
 0x280   : > { %1902 = vmatprep.subr.bf16.mxu0 %v1901_v38  ;;  %v1905_v4 = vpack.c.bf16 %v1520_v1, %v1518_v62  ;;  %v1517_v5 = vld [vmem:[#allocation10 + $0x260] sm:$0xff]  ;;  %v1519_v6 = vld [vmem:[#allocation10 + $0x270] sm:$0xff]  ;;  %v1458_v7 = vld [vmem:[#allocation10 + $0x88] sm:$0xff]  ;;  %v1843_v11 = vpack.c.bf16 %v1455_v3, %v1453_v2 }
 0x281   : > { %v1460_v8 = vld [vmem:[#allocation10 + $0x98] sm:$0xff]  ;;  %v1522_v9 = vld [vmem:[#allocation10 + $0x288] sm:$0xff]  ;;  %v1907_v12 = vpack.c.bf16 %v1519_v6, %v1517_v5  ;;  %v1457_v14 = vld [vmem:[#allocation10 + $0x80] sm:$0xff] }
 0x282   : > { %v1524_v10 = vld [vmem:[#allocation10 + $0x298] sm:$0xff]  ;;  %1840 = vmatpush1.bf16.msra.mxu1 %v1839_v59  ;;  %v1845_v13 = vpack.c.bf16 %v1460_v8, %v1458_v7  ;;  %v1459_v15 = vld [vmem:[#allocation10 + $0x90] sm:$0xff]  ;;  %v1521_v16 = vld [vmem:[#allocation10 + $0x280] sm:$0xff]  ;;  %v1080_v59 = vlaneseq }
 0x283   : > { %1904 = vmatpush1.bf16.msra.mxu0 %v1903_v63  ;;  %1842 = vmatprep.subr.bf16.mxu1 %v1841_v0  ;;  %v1909_v17 = vpack.c.bf16 %v1524_v10, %v1522_v9  ;;  %v1523_v18 = vld [vmem:[#allocation10 + $0x290] sm:$0xff]  ;;  %v1462_v19 = vld [vmem:[#allocation10 + $0xa8] sm:$0xff]  ;;  %v1464_v20 = vld [vmem:[#allocation10 + $0xb8] sm:$0xff]  ;;  %v1847_v21 = vpack.c.bf16 %v1459_v15, %v1457_v14 }
 0x284   : > { %1906 = vmatprep.subr.bf16.mxu0 %v1905_v4  ;;  %v1526_v47 = vld [vmem:[#allocation10 + $0x2a8] sm:$0xff]  ;;  %v1528_v48 = vld [vmem:[#allocation10 + $0x2b8] sm:$0xff]  ;;  %v1911_v22 = vpack.c.bf16 %v1523_v18, %v1521_v16  ;;  %v1849_v23 = vpack.c.bf16 %v1464_v20, %v1462_v19  ;;  %v1461_v24 = vld [vmem:[#allocation10 + $0xa0] sm:$0xff]  ;;  %v2672_v14 = vshrl.u32 %v1080_v59, 7 }
 0x285   : > { %v1463_v25 = vld [vmem:[#allocation10 + $0xb0] sm:$0xff]  ;;  %v1525_v26 = vld [vmem:[#allocation10 + $0x2a0] sm:$0xff]  ;;  %v1913_v57 = vpack.c.bf16 %v1528_v48, %v1526_v47  ;;  %v1466_v27 = vld [vmem:[#allocation10 + $0xc8] sm:$0xff]  ;;  %v1083_v48 = vstv %s2628_s9 }
 0x286   : > { %1844 = vmatpush1.bf16.msra.mxu1 %v1843_v11  ;;  %v1527_v58 = vld [vmem:[#allocation10 + $0x2b0] sm:$0xff]  ;;  %v1468_v28 = vld [vmem:[#allocation10 + $0xd8] sm:$0xff]  ;;  %v1530_v31 = vld [vmem:[#allocation10 + $0x2c8] sm:$0xff]  ;;  %v1851_v33 = vpack.c.bf16 %v1463_v25, %v1461_v24  ;;  %3178 = vst [vmem:[#allocation16_spill] sm:$0xff] %v2672_v14  ;;  %vm2743_vm1 = vcmp.eq.s32.totalorder %v2672_v14, %v1083_v48 }
 0x287   : > { %1908 = vmatpush1.bf16.msra.mxu0 %v1907_v12  ;;  %1846 = vmatprep.subr.bf16.mxu1 %v1845_v13  ;;  %v1532_v32 = vld [vmem:[#allocation10 + $0x2d8] sm:$0xff]  ;;  %v1915_v34 = vpack.c.bf16 %v1527_v58, %v1525_v26  ;;  %v1853_v35 = vpack.c.bf16 %v1468_v28, %v1466_v27  ;;  %v1465_v36 = vld [vmem:[#allocation10 + $0xc0] sm:$0xff]  ;;  %v1467_v39 = vld [vmem:[#allocation10 + $0xd0] sm:$0xff] }
 0x288   : > { %1910 = vmatprep.subr.bf16.mxu0 %v1909_v17  ;;  %v1529_v40 = vld [vmem:[#allocation10 + $0x2c0] sm:$0xff]  ;;  %v1917_v41 = vpack.c.bf16 %v1532_v32, %v1530_v31  ;;  %v1531_v42 = vld [vmem:[#allocation10 + $0x2d0] sm:$0xff]  ;;  %v1470_v43 = vld [vmem:[#allocation10 + $0xe8] sm:$0xff]  ;;  %v1855_v49 = vpack.c.bf16 %v1467_v39, %v1465_v36 }
 0x289   : > { %v1472_v44 = vld [vmem:[#allocation10 + $0xf8] sm:$0xff]  ;;  %v1534_v45 = vld [vmem:[#allocation10 + $0x2e8] sm:$0xff]  ;;  %v1919_v50 = vpack.c.bf16 %v1531_v42, %v1529_v40  ;;  %v1469_v52 = vld [vmem:[#allocation10 + $0xe0] sm:$0xff] }
 0x28a   : > { %1848 = vmatpush1.bf16.msra.mxu1 %v1847_v21  ;;  %v1536_v46 = vld [vmem:[#allocation10 + $0x2f8] sm:$0xff]  ;;  %v1857_v51 = vpack.c.bf16 %v1472_v44, %v1470_v43  ;;  %v1471_v53 = vld [vmem:[#allocation10 + $0xf0] sm:$0xff]  ;;  %v1533_v54 = vld [vmem:[#allocation10 + $0x2e0] sm:$0xff]  ;;  %v1125_v21 = vstv %s2630_s8 }
 0x28b   : > { %1912 = vmatpush1.bf16.msra.mxu0 %v1911_v22  ;;  %1850 = vmatprep.subr.bf16.mxu1 %v1849_v23  ;;  %v1921_v37 = vpack.c.bf16 %v1536_v46, %v1534_v45  ;;  %v1535_v29 = vld [vmem:[#allocation10 + $0x2f0] sm:$0xff]  ;;  %v1474_v38 = vld [vmem:[#allocation10 + $0x108] sm:$0xff]  ;;  %v1476_v30 = vld [vmem:[#allocation10 + $0x118] sm:$0xff]  ;;  %v1859_v60 = vpack.c.bf16 %v1471_v53, %v1469_v52  ;;  %v1160_v22 = vstv %s2632_s20  ;;  %v1265_v46 = vstv %s2638_s23 }
 0x28c   : > { %1914 = vmatprep.subr.bf16.mxu0 %v1913_v57  ;;  %v1538_v55 = vld [vmem:[#allocation10 + $0x308] sm:$0xff]  ;;  %v1540_v56 = vld [vmem:[#allocation10 + $0x318] sm:$0xff]  ;;  %v2644_v61 = vld [vmem:[#allocation10 + $0x100] sm:$0xff]  ;;  %v1923_v63 = vpack.c.bf16 %v1535_v29, %v1533_v54  ;;  %v1861_v0 = vpack.c.bf16 %v1476_v30, %v1474_v38  ;;  %vm2748_vm2 = vcmp.eq.s32.totalorder %v2672_v14, %v1125_v21  ;;  %vm2753_vm3 = vcmp.eq.s32.totalorder %v2672_v14, %v1160_v22 }
 0x28d   : > { %v2646_v62 = vld [vmem:[#allocation10 + $0x110] sm:$0xff]  ;;  %v2648_v1 = vld [vmem:[#allocation10 + $0x300] sm:$0xff]  ;;  %v2652_v3 = vld [vmem:[#allocation10 + $0x128] sm:$0xff]  ;;  %v1925_v4 = vpack.c.bf16 %v1540_v56, %v1538_v55  ;;  %v1415_v30 = vsub.s32 1, %v2672_v14  ;;  %vm2793_vm6 = vcmp.eq.s32.totalorder %v2672_v14, %v1265_v46 }
 0x28e   : > { %1852 = vmatpush1.bf16.msra.mxu1 %v1851_v33  ;;  %v2650_v2 = vld [vmem:[#allocation10 + $0x310] sm:$0xff]  ;;  %v2654_v5 = vld [vmem:[#allocation10 + $0x138] sm:$0xff]  ;;  %v2656_v6 = vld [vmem:[#allocation10 + $0x328] sm:$0xff]  ;;  %v1863_v15 = vpack.c.bf16 %v2646_v62, %v2644_v61  ;;  %v1195_v33 = vstv %s2634_s21 }
 0x28f   : > { %1916 = vmatpush1.bf16.msra.mxu0 %v1915_v34  ;;  %1854 = vmatprep.subr.bf16.mxu1 %v1853_v35  ;;  %v2658_v7 = vld [vmem:[#allocation10 + $0x338] sm:$0xff]  ;;  %v2660_v8 = vld [vmem:[#allocation10 + $0x120] sm:$0xff]  ;;  %v2662_v9 = vld [vmem:[#allocation10 + $0x130] sm:$0xff]  ;;  %v1927_v23 = vpack.c.bf16 %v2650_v2, %v2648_v1  ;;  %v1865_v24 = vpack.c.bf16 %v2654_v5, %v2652_v3  ;;  %v1230_v34 = vstv %s2636_s13  ;;  %vm2771_vm4 = vcmp.eq.s32.totalorder %v2672_v14, %v1195_v33 }
 0x290   : > { %1918 = vmatprep.subr.bf16.mxu0 %v1917_v41  ;;  %v2664_v10 = vld [vmem:[#allocation10 + $0x320] sm:$0xff]  ;;  %v2666_v11 = vld [vmem:[#allocation10 + $0x330] sm:$0xff]  ;;  %v2668_v12 = vld [vmem:[#allocation10 + $0x148] sm:$0xff]  ;;  %v1929_v35 = vpack.c.bf16 %v2658_v7, %v2656_v6  ;;  %v1867_v55 = vpack.c.bf16 %v2662_v9, %v2660_v8  ;;  %vm2788_vm5 = vcmp.eq.s32.totalorder %v2672_v14, %v1230_v34  ;;  %v3191_v8 = vmov 0 }
 0x291   : > { %v2670_v13 = vld [vmem:[#allocation10 + $0x158] sm:$0xff]  ;;  %v2676_v16 = vld [vmem:[#allocation10 + $0x348] sm:$0xff]  ;;  %v2680_v18 = vld [vmem:[#allocation10 + $0x140] sm:$0xff]  ;;  %v1931_v56 = vpack.c.bf16 %v2666_v11, %v2664_v10  ;;  %v3194_v9 = vmov 0  ;;  %v1423_v10 = vsub.s32 3, %v2672_v14 }
 0x292   : > { %1856 = vmatpush1.bf16.msra.mxu1 %v1855_v49  ;;  %v2678_v17 = vld [vmem:[#allocation10 + $0x358] sm:$0xff]  ;;  %v2682_v19 = vld [vmem:[#allocation10 + $0x150] sm:$0xff]  ;;  %v2684_v20 = vld [vmem:[#allocation10 + $0x340] sm:$0xff]  ;;  %v1300_v49 = vstv %s2640_s26  ;;  %v1869_v59 = vpack.c.bf16 %v2670_v13, %v2668_v12 }
 0x293   : > { %1920 = vmatpush1.bf16.msra.mxu0 %v1919_v50  ;;  %1858 = vmatprep.subr.bf16.mxu1 %v1857_v51  ;;  %v2686_v47 = vld [vmem:[#allocation10 + $0x350] sm:$0xff]  ;;  %v2695_v25 = vld [vmem:[#allocation10 + $0x168] sm:$0xff]  ;;  %v2697_v26 = vld [vmem:[#allocation10 + $0x178] sm:$0xff]  ;;  %v1335_v50 = vstv %s2642_s27  ;;  %v1871_v1 = vpack.c.bf16 %v2682_v19, %v2680_v18  ;;  %vm2798_vm7 = vcmp.eq.s32.totalorder %v2672_v14, %v1300_v49 }
 0x294   : > { %1922 = vmatprep.subr.bf16.mxu0 %v1921_v37  ;;  %v2699_v57 = vld [vmem:[#allocation10 + $0x368] sm:$0xff]  ;;  %v2701_v58 = vld [vmem:[#allocation10 + $0x378] sm:$0xff]  ;;  %v2703_v27 = vld [vmem:[#allocation10 + $0x160] sm:$0xff]  ;;  %v1935_v2 = vpack.c.bf16 %v2686_v47, %v2684_v20  ;;  %v3192_v8 = vsel %vm2798_vm7, 4294967295, %v3191_v8  ;;  %vm2803_vm8 = vcmp.eq.s32.totalorder %v2672_v14, %v1335_v50  ;;  %v1873_v11 = vpack.c.bf16 %v2697_v26, %v2695_v25 }
 0x295   : > { %v2705_v28 = vld [vmem:[#allocation10 + $0x170] sm:$0xff]  ;;  %v2707_v31 = vld [vmem:[#allocation10 + $0x360] sm:$0xff]  ;;  %v2715_v36 = vld [vmem:[#allocation10 + $0x188] sm:$0xff]  ;;  %3193 = vst [vmem:[#allocation17_spill] sm:$0xff] %v3192_v8  ;;  %v3195_v9 = vsel %vm2803_vm8, 4294967295, %v3194_v9  ;;  %v1937_v12 = vpack.c.bf16 %v2701_v58, %v2699_v57 }
 0x296   : > { %1860 = vmatpush1.bf16.msra.mxu1 %v1859_v60  ;;  %v2709_v32 = vld [vmem:[#allocation10 + $0x370] sm:$0xff]  ;;  %v2717_v39 = vld [vmem:[#allocation10 + $0x198] sm:$0xff]  ;;  %v2719_v40 = vld [vmem:[#allocation10 + $0x388] sm:$0xff]  ;;  %3196 = vst [vmem:[#allocation18_spill] sm:$0xff] %v3195_v9  ;;  %v1875_v13 = vpack.c.bf16 %v2705_v28, %v2703_v27 }
 0x297   : > { %1924 = vmatpush1.bf16.msra.mxu0 %v1923_v63  ;;  %1862 = vmatprep.subr.bf16.mxu1 %v1861_v0  ;;  %v2721_v41 = vld [vmem:[#allocation10 + $0x398] sm:$0xff]  ;;  %v2723_v42 = vld [vmem:[#allocation10 + $0x180] sm:$0xff]  ;;  %v2725_v43 = vld [vmem:[#allocation10 + $0x190] sm:$0xff]  ;;  %v1933_v0 = vpack.c.bf16 %v2678_v17, %v2676_v16 }
 0x298   : > { %1926 = vmatprep.subr.bf16.mxu0 %v1925_v4  ;;  %v2727_v44 = vld [vmem:[#allocation10 + $0x380] sm:$0xff]  ;;  %v2729_v45 = vld [vmem:[#allocation10 + $0x390] sm:$0xff]  ;;  %v2734_v51 = vld [vmem:[#allocation10 + $0x1a8] sm:$0xff] }
 0x299   : > { %v2736_v52 = vld [vmem:[#allocation10 + $0x1b8] sm:$0xff]  ;;  %v2738_v53 = vld [vmem:[#allocation10 + $0x3a8] sm:$0xff]  ;;  %v2764_v60 = vld [vmem:[#allocation10 + $0x1a0] sm:$0xff] }
 0x29a   : > { %v2740_v54 = vld [vmem:[#allocation10 + $0x3b8] sm:$0xff]  ;;  %1864 = vmatpush1.bf16.msra.mxu1 %v1863_v15  ;;  %v2766_v61 = vld [vmem:[#allocation10 + $0x1b0] sm:$0xff]  ;;  %v2768_v62 = vld [vmem:[#allocation10 + $0x3a0] sm:$0xff] }
 0x29b   : > { %1928 = vmatpush1.bf16.msra.mxu0 %v1927_v23  ;;  %1866 = vmatprep.subr.bf16.mxu1 %v1865_v24  ;;  %v2781_v3 = vld [vmem:[#allocation10 + $0x3b0] sm:$0xff]  ;;  %v2783_v4 = vld [vmem:[#allocation10 + $0x1c8] sm:$0xff]  ;;  %v2785_v5 = vld [vmem:[#allocation10 + $0x1d8] sm:$0xff] }
 0x29c   : > { %1930 = vmatprep.subr.bf16.mxu0 %v1929_v35  ;;  %v2816_v16 = vld [vmem:[#allocation10 + $0x3c8] sm:$0xff]  ;;  %v2818_v17 = vld [vmem:[#allocation10 + $0x3d8] sm:$0xff]  ;;  %v2820_v18 = vld [vmem:[#allocation10 + $0x1c0] sm:$0xff] }
 0x29d   : > { %v2830_v21 = vld [vmem:[#allocation10 + $0x1d0] sm:$0xff]  ;;  %v2832_v22 = vld [vmem:[#allocation10 + $0x3c0] sm:$0xff]  ;;  %v2844_v58 = vld [vmem:[#allocation10 + $0x1e8] sm:$0xff] }
 0x29e   : > { %v2834_v23 = vld [vmem:[#allocation10 + $0x3d0] sm:$0xff]  ;;  %1868 = vmatpush1.bf16.msra.mxu1 %v1867_v55  ;;  %v2846_v27 = vld [vmem:[#allocation10 + $0x1f8] sm:$0xff]  ;;  %v2848_v28 = vld [vmem:[#allocation10 + $0x3e8] sm:$0xff] }
 0x29f   : > { %1932 = vmatpush1.bf16.msra.mxu0 %v1931_v56  ;;  %1870 = vmatprep.subr.bf16.mxu1 %v1869_v59  ;;  %v2856_v46 = vld [vmem:[#allocation10 + $0x3f8] sm:$0xff]  ;;  %v2858_v49 = vld [vmem:[#allocation10 + $0x1e0] sm:$0xff]  ;;  %v2860_v50 = vld [vmem:[#allocation10 + $0x1f0] sm:$0xff] }
 0x2a0   : > { %1934 = vmatprep.subr.bf16.mxu0 %v1933_v0  ;;  %v2871_v33 = vld [vmem:[#allocation10 + $0x3e0] sm:$0xff]  ;;  %v2873_v57 = vld [vmem:[#allocation10 + $0x3f0] sm:$0xff]  ;;  %v2881_v56 = vld [vmem:[#allocation7] sm:$0xf] }
 0x2a1   : > { %v2875_v26 = vld [vmem:[#allocation9] sm:$0xff]  ;;  %3198 = vst [vmem:[#allocation20_spill] sm:$0xff] %v2881_v56  ;;  %v2883_v59 = vld [vmem:[#allocation9 + $0x8] sm:$0xff]  ;;  %v2894_v0 = vrot.slane %v2881_v56, %v1415_v30  ;;  %v2901_v24 = vrot.slane %v2881_v56, %v1423_v10 }
 0x2a2   : > { %3197 = vst [vmem:[#allocation19_spill] sm:$0xff] %v2875_v26  ;;  %v1087_v55 = vcombine.high %v2875_v26, %v2875_v26  ;;  %3199 = vst [vmem:[#allocation21_spill] sm:$0xff] %v2883_v59  ;;  %v1091_v35 = vsel %vm2743_vm1, %v2875_v26, 0.0  ;;  %1872 = vmatpush1.bf16.msra.mxu1 %v1871_v1  ;;  %v2898_v25 = vcombine.high %v2883_v59, %v2883_v59 }
 0x2a3   : > { %3200 = vst [vmem:[#allocation22_spill] sm:$0xff] %v2901_v24  ;;  %v2904_v48 = vsel %vm1095_vm0, %v1091_v35, 0.0  ;;  %1936 = vmatpush1.bf16.msra.mxu0 %v1935_v2  ;;  %1874 = vmatprep.subr.bf16.mxu1 %v1873_v11  ;;  %v3204_v24 = vpack.c.bf16 %v2721_v41, %v2719_v40  ;;  %v3206_v41 = vpack.c.bf16 %v2729_v45, %v2727_v44 }
 0x2a4   : > { %3201 = vst [vmem:[#allocation23_spill] sm:$0xff] %v2904_v48  ;;  %v1092_v1 = vsel %vm2743_vm1, %v1087_v55, 0.0  ;;  %v1128_v34 = vsel %vm2748_vm2, %v1087_v55, 0.0  ;;  %v1163_v30 = vsel %vm2753_vm3, %v1087_v55, 0.0  ;;  %v1198_v47 = vsel %vm2771_vm4, %v1087_v55, 0.0  ;;  %1938 = vmatprep.subr.bf16.mxu0 %v1937_v12 }
 0x2a5   : > { %v1103_v10 = vsel %vm1095_vm0, %v1092_v1, 0.0  ;;  %v1138_v35 = vsel %vm1095_vm0, %v1128_v34, 0.0  ;;  %v1173_v2 = vsel %vm1095_vm0, %v1163_v30, 0.0  ;;  %v1208_v11 = vsel %vm1095_vm0, %v1198_v47, 0.0 }
 0x2a6   : > { %v1104_v20 = vrot.slane %v1103_v10, 4  ;;  %v1139_v19 = vrot.slane %v1138_v35, 4  ;;  %v1174_v15 = vrot.slane %v1173_v2, 4  ;;  %v1209_v59 = vrot.slane %v1208_v11, 4  ;;  %1876 = vmatpush1.bf16.msra.mxu1 %v1875_v13 }
 0x2a7   : > { %v1233_v56 = vsel %vm2788_vm5, %v1087_v55, 0.0  ;;  %v1268_v14 = vsel %vm2793_vm6, %v1087_v55, 0.0  ;;  %v1303_v12 = vsel %vm2798_vm7, %v1087_v55, 0.0  ;;  %v1338_v34 = vsel %vm2803_vm8, %v1087_v55, 0.0 }
 0x2a8   : > { %v3202_v47 = vpack.c.bf16 %v2709_v32, %v2707_v31  ;;  %v3203_v13 = vpack.c.bf16 %v2717_v39, %v2715_v36  ;;  %v1105_v1 = vadd.f32 %v1104_v20, %v1103_v10  ;;  %v1140_v30 = vadd.f32 %v1139_v19, %v1138_v35 }
 0x2a9   : > { %v1175_v26 = vadd.f32 %v1174_v15, %v1173_v2  ;;  %v1243_v48 = vsel %vm1095_vm0, %v1233_v56, 0.0  ;;  %v1210_v55 = vadd.f32 %v1209_v59, %v1208_v11  ;;  %v1278_v8 = vsel %vm1095_vm0, %v1268_v14, 0.0 }
 0x2aa   : > { %1940 = vmatpush1.bf16.msra.mxu0 %v3202_v47  ;;  %1878 = vmatprep.subr.bf16.mxu1 %v3203_v13  ;;  %v1244_v9 = vrot.slane %v1243_v48, 4  ;;  %v1313_v31 = vsel %vm1095_vm0, %v1303_v12, 0.0  ;;  %v1106_v32 = vrot.slane %v1105_v1, 2  ;;  %v1141_v36 = vrot.slane %v1140_v30, 2 }
 0x2ab   : > { %1942 = vmatprep.subr.bf16.mxu0 %v3204_v24  ;;  %v1176_v39 = vrot.slane %v1175_v26, 2  ;;  %v1279_v20 = vrot.slane %v1278_v8, 4  ;;  %v3205_v15 = vpack.c.bf16 %v2725_v43, %v2723_v42  ;;  %v1211_v19 = vrot.slane %v1210_v55, 2 }
 0x2ac   : > { %v1245_v56 = vadd.f32 %v1244_v9, %v1243_v48  ;;  %v1314_v10 = vrot.slane %v1313_v31, 4  ;;  %v1348_v40 = vsel %vm1095_vm0, %v1338_v34, 0.0  ;;  %v3207_v14 = vpack.c.bf16 %v2736_v52, %v2734_v51 }
 0x2ad   : > { %1880 = vmatpush1.bf16.msra.mxu1 %v3205_v15  ;;  %v1107_v24 = vadd.f32 %v1106_v32, %v1105_v1  ;;  %v1142_v59 = vadd.f32 %v1141_v36, %v1140_v30  ;;  %v1177_v35 = vadd.f32 %v1176_v39, %v1175_v26  ;;  %v1349_v2 = vrot.slane %v1348_v40, 4 }
 0x2ae   : > { %1944 = vmatpush1.bf16.msra.mxu0 %v3206_v41  ;;  %1882 = vmatprep.subr.bf16.mxu1 %v3207_v14  ;;  %v3208_v42 = vpack.c.bf16 %v2740_v54, %v2738_v53  ;;  %v1212_v43 = vadd.f32 %v1211_v19, %v1210_v55  ;;  %v1246_v9 = vrot.slane %v1245_v56, 2  ;;  %v1280_v48 = vadd.f32 %v1279_v20, %v1278_v8  ;;  %v1404_v53 = vld [vmem:[#allocation2 + $0x8] sm:$0xff] }
 0x2af   : > { %v1315_v11 = vadd.f32 %v1314_v10, %v1313_v31  ;;  %v1108_v44 = vrot.slane %v1107_v24, 1  ;;  %v1143_v45 = vrot.slane %v1142_v59, 1  ;;  %v1178_v12 = vrot.slane %v1177_v35, 1 }
 0x2b0   : > { %1946 = vmatprep.subr.bf16.mxu0 %v3208_v42  ;;  %v1350_v34 = vadd.f32 %v1349_v2, %v1348_v40  ;;  %v3209_v51 = vpack.c.bf16 %v2766_v61, %v2764_v60  ;;  %v1213_v52 = vrot.slane %v1212_v43, 1  ;;  %v1247_v26 = vadd.f32 %v1246_v9, %v1245_v56 }
 0x2b1   : > { %v1281_v47 = vrot.slane %v1280_v48, 2  ;;  %v1316_v13 = vrot.slane %v1315_v11, 2  ;;  %v3210_v54 = vpack.c.bf16 %v2781_v3, %v2768_v62  ;;  %v3211_v8 = vpack.c.bf16 %v2785_v5, %v2783_v4 }
 0x2b2   : > { %1884 = vmatpush1.bf16.msra.mxu1 %v3209_v51  ;;  %v1109_v1 = vadd.f32 %v1108_v44, %v1107_v24  ;;  %v1144_v30 = vadd.f32 %v1143_v45, %v1142_v59  ;;  %v1179_v55 = vadd.f32 %v1178_v12, %v1177_v35  ;;  %v1351_v31 = vrot.slane %v1350_v34, 2 }
 0x2b3   : > { %1948 = vmatpush1.bf16.msra.mxu0 %v3210_v54  ;;  %1886 = vmatprep.subr.bf16.mxu1 %v3211_v8  ;;  %v3212_v60 = vpack.c.bf16 %v2818_v17, %v2816_v16  ;;  %v1214_v61 = vadd.f32 %v1213_v52, %v1212_v43  ;;  %v1248_v32 = vrot.slane %v1247_v26, 1  ;;  %v1282_v36 = vadd.f32 %v1281_v47, %v1280_v48 }
 0x2b4   : > { %v1317_v39 = vadd.f32 %v1316_v13, %v1315_v11  ;;  %v1352_v20 = vadd.f32 %v1351_v31, %v1350_v34  ;;  %v1371_v62 = vsel %vm1369_vm9, %v1109_v1, %v1144_v30  ;;  %v1430_v3 = vmul.f32 %v2894_v0, %v1404_v53 }
 0x2b5   : > { %1950 = vmatprep.subr.bf16.mxu0 %v3212_v60  ;;  %v1094_v4 = vsel %vm2743_vm1, %v2898_v25, 0.0  ;;  %v3213_v5 = vpack.c.bf16 %v2830_v21, %v2820_v18  ;;  %v1249_v15 = vadd.f32 %v1248_v32, %v1247_v26  ;;  %v1283_v16 = vrot.slane %v1282_v36, 1 }
 0x2b6   : > { %v1318_v17 = vrot.slane %v1317_v39, 1  ;;  %v1376_v19 = vsel %vm1374_vm10, %v1371_v62, %v1179_v55  ;;  %v3214_v56 = vpack.c.bf16 %v2834_v23, %v2832_v22  ;;  %v3215_v0 = vpack.c.bf16 %v2846_v27, %v2844_v58 }
 0x2b7   : > { %1888 = vmatpush1.bf16.msra.mxu1 %v3213_v5  ;;  %v1353_v10 = vrot.slane %v1352_v20, 1  ;;  %v1381_v40 = vsel %vm1379_vm11, %v1376_v19, %v1214_v61  ;;  %v1117_v41 = vsel %vm1095_vm0, %v1094_v4, 0.0  ;;  %v1130_v18 = vsel %vm2748_vm2, %v2898_v25, 0.0  ;;  %v1406_v4 = vld [vmem:[#allocation2 + $0x18] sm:$0xff] }
 0x2b8   : > { %1952 = vmatpush1.bf16.msra.mxu0 %v3214_v56  ;;  %1890 = vmatprep.subr.bf16.mxu1 %v3215_v0  ;;  %v3216_v21 = vpack.c.bf16 %v2856_v46, %v2848_v28  ;;  %v1284_v14 = vadd.f32 %v1283_v16, %v1282_v36  ;;  %v1319_v22 = vadd.f32 %v1318_v17, %v1317_v39  ;;  %v1118_v24 = vrot.slane %v1117_v41, 4 }
 0x2b9   : > { %v1385_v23 = vsel %vm1095_vm0, %v1381_v40, %v1249_v15  ;;  %v1354_v58 = vadd.f32 %v1353_v10, %v1352_v20  ;;  %v1152_v27 = vsel %vm1095_vm0, %v1130_v18, 0.0  ;;  %v1165_v59 = vsel %vm2753_vm3, %v2898_v25, 0.0  ;;  %v3221_v18 = vld [vmem:[#allocation22_spill] sm:$0xff] }
 0x2ba   : > { %1954 = vmatprep.subr.bf16.mxu0 %v3216_v21  ;;  %v1200_v35 = vsel %vm2771_vm4, %v2898_v25, 0.0  ;;  %v3217_v28 = vpack.c.bf16 %v2860_v50, %v2858_v49  ;;  %v1390_v46 = vsel %vm1388_vm12, %v1385_v23, %v1284_v14  ;;  %v1119_v2 = vadd.f32 %v1118_v24, %v1117_v41 }
 0x2bb   : > { %v1153_v42 = vrot.slane %v1152_v27, 4  ;;  %v1187_v43 = vsel %vm1095_vm0, %v1165_v59, 0.0  ;;  %v3218_v9 = vpack.c.bf16 %v2873_v57, %v2871_v33  ;;  %v1395_v48 = vsel %vm1393_vm13, %v1390_v46, %v1319_v22 }
 0x2bc   : > { %1892 = vmatpush1.bf16.msra.mxu1 %v3217_v28  ;;  %v1188_v11 = vrot.slane %v1187_v43, 4  ;;  %v1222_v44 = vsel %vm1095_vm0, %v1200_v35, 0.0  ;;  %v1235_v49 = vsel %vm2788_vm5, %v2898_v25, 0.0  ;;  %v1400_v50 = vsel %vm1398_vm14, %v1395_v48, %v1354_v58  ;;  %v3222_v35 = vld [vmem:[#allocation23_spill] sm:$0xff] }
 0x2bd   : > { %1956 = vmatpush1.bf16.msra.mxu0 %v3218_v9  ;;  %v1120_v45 = vrot.slane %v1119_v2, 2  ;;  %v1154_v12 = vadd.f32 %v1153_v42, %v1152_v27  ;;  %v1223_v34 = vrot.slane %v1222_v44, 4  ;;  %v1434_v51 = vadd.f32 %v1430_v3, %v1400_v50 }
 0x2be   : > { %v1189_v52 = vadd.f32 %v1188_v11, %v1187_v43  ;;  %v1257_v26 = vsel %vm1095_vm0, %v1235_v49, 0.0  ;;  %v1270_v57 = vsel %vm2793_vm6, %v2898_v25, 0.0  ;;  %v1305_v30 = vsel %vm2798_vm7, %v2898_v25, 0.0 }
 0x2bf   : > { %v1121_v33 = vadd.f32 %v1120_v45, %v1119_v2  ;;  %v1155_v47 = vrot.slane %v1154_v12, 2  ;;  %v1224_v13 = vadd.f32 %v1223_v34, %v1222_v44  ;;  %v1258_v53 = vrot.slane %v1257_v26, 4  ;;  %1438 = vst [vmem:[%s3148_s6 + $0x8] sm:$0xff] %v1434_v51  ;;  %1633 = vmatprep.mubr.f32.mxu1 %v1434_v51  ;;  %v3223_v44 = vld [vmem:[#allocation19_spill] sm:$0xff] }
 0x2c0   : > { %v1190_v54 = vrot.slane %v1189_v52, 2  ;;  %v1292_v8 = vsel %vm1095_vm0, %v1270_v57, 0.0  ;;  %v1340_v31 = vsel %vm2803_vm8, %v2898_v25, 0.0  ;;  %v1327_v62 = vsel %vm1095_vm0, %v1305_v30, 0.0 }
 0x2c1   : > { %v1122_v60 = vrot.slane %v1121_v33, 1  ;;  %v1156_v61 = vadd.f32 %v1155_v47, %v1154_v12  ;;  %v1225_v32 = vrot.slane %v1224_v13, 2  ;;  %v1259_v36 = vadd.f32 %v1258_v53, %v1257_v26 }
 0x2c2   : > { %v1191_v39 = vadd.f32 %v1190_v54, %v1189_v52  ;;  %v1293_v20 = vrot.slane %v1292_v8, 4  ;;  %v1362_v3 = vsel %vm1095_vm0, %v1340_v31, 0.0  ;;  %v1328_v0 = vrot.slane %v1327_v62, 4 }
 0x2c3   : > { %v1123_v5 = vadd.f32 %v1122_v60, %v1121_v33  ;;  %v1157_v15 = vrot.slane %v1156_v61, 1  ;;  %v1226_v16 = vadd.f32 %v1225_v32, %v1224_v13  ;;  %v1260_v17 = vrot.slane %v1259_v36, 2 }
 0x2c4   : > { %v1192_v19 = vrot.slane %v1191_v39, 1  ;;  %v1294_v56 = vadd.f32 %v1293_v20, %v1292_v8  ;;  %v1363_v10 = vrot.slane %v1362_v3, 4  ;;  %v1432_v21 = vmul.f32 %v3221_v18, %v1406_v4 }
 0x2c5   : > { %v1158_v25 = vadd.f32 %v1157_v15, %v1156_v61  ;;  %v1227_v40 = vrot.slane %v1226_v16, 1  ;;  %v1261_v41 = vadd.f32 %v1260_v17, %v1259_v36  ;;  %v1329_v23 = vadd.f32 %v1328_v0, %v1327_v62 }
 0x2c6   : > { %v1193_v14 = vadd.f32 %v1192_v19, %v1191_v39  ;;  %v1295_v22 = vrot.slane %v1294_v56, 2  ;;  %v1364_v24 = vadd.f32 %v1363_v10, %v1362_v3  ;;  %v1097_v28 = vrot.slane %v3222_v35, 4 }
 0x2c7   : > { %v1228_v58 = vadd.f32 %v1227_v40, %v1226_v16  ;;  %v1262_v27 = vrot.slane %v1261_v41, 1  ;;  %v1373_v59 = vsel %vm1369_vm9, %v1123_v5, %v1158_v25  ;;  %v1330_v2 = vrot.slane %v1329_v23, 2 }
 0x2c8   : > { %v1296_v46 = vadd.f32 %v1295_v22, %v1294_v56  ;;  %v1365_v42 = vrot.slane %v1364_v24, 2  ;;  %v1378_v43 = vsel %vm1374_vm10, %v1373_v59, %v1193_v14  ;;  %v1098_v11 = vadd.f32 %v1097_v28, %v3222_v35 }
 0x2c9   : > { %v1263_v9 = vadd.f32 %v1262_v27, %v1261_v41  ;;  %v1383_v48 = vsel %vm1379_vm11, %v1378_v43, %v1228_v58  ;;  %v3224_v49 = vsel %vm2748_vm2, %v3223_v44, 0.0  ;;  %v1331_v12 = vadd.f32 %v1330_v2, %v1329_v23 }
 0x2ca   : > { %v1131_v50 = vsel %vm1095_vm0, %v3224_v49, 0.0  ;;  %v1297_v45 = vrot.slane %v1296_v46, 1  ;;  %v1366_v34 = vadd.f32 %v1365_v42, %v1364_v24  ;;  %v1099_v26 = vrot.slane %v1098_v11, 2  ;;  %v1403_v42 = vld [vmem:[#allocation2] sm:$0xff] }
 0x2cb   : > { %v1132_v51 = vrot.slane %v1131_v50, 4  ;;  %v1387_v52 = vsel %vm1095_vm0, %v1383_v48, %v1263_v9  ;;  %v1162_v57 = vsel %vm2753_vm3, %v3223_v44, 0.0  ;;  %v1197_v33 = vsel %vm2771_vm4, %v3223_v44, 0.0 }
 0x2cc   : > { %v1298_v47 = vadd.f32 %v1297_v45, %v1296_v46  ;;  %v1332_v13 = vrot.slane %v1331_v12, 1  ;;  %v1367_v53 = vrot.slane %v1366_v34, 1  ;;  %v1100_v8 = vadd.f32 %v1099_v26, %v1098_v11  ;;  %v3225_v11 = vld [vmem:[#allocation16_spill] sm:$0xff] }
 0x2cd   : > { %v1133_v54 = vadd.f32 %v1132_v51, %v1131_v50  ;;  %v1166_v30 = vsel %vm1095_vm0, %v1162_v57, 0.0  ;;  %v1201_v31 = vsel %vm1095_vm0, %v1197_v33, 0.0  ;;  %v1232_v60 = vsel %vm2788_vm5, %v3223_v44, 0.0  ;;  %v3227_v50 = vld [vmem:[#allocation20_spill] sm:$0xff]  ;;  %v3228_v33 = vld [vmem:[#allocation21_spill] sm:$0xff] }
 0x2ce   : > { %v1333_v61 = vadd.f32 %v1332_v13, %v1331_v12  ;;  %v1368_v32 = vadd.f32 %v1367_v53, %v1366_v34  ;;  %v1392_v36 = vsel %vm1388_vm12, %v1387_v52, %v1298_v47  ;;  %v1101_v20 = vrot.slane %v1100_v8, 1 }
 0x2cf   : > { %v1134_v39 = vrot.slane %v1133_v54, 2  ;;  %v1167_v62 = vrot.slane %v1166_v30, 4  ;;  %v1202_v3 = vrot.slane %v1201_v31, 4  ;;  %v1236_v4 = vsel %vm1095_vm0, %v1232_v60, 0.0 }
 0x2d0   : > { %v1397_v5 = vsel %vm1393_vm13, %v1392_v36, %v1333_v61  ;;  %v1237_v16 = vrot.slane %v1236_v4, 4  ;;  %v1267_v17 = vsel %vm2793_vm6, %v3223_v44, 0.0  ;;  %v1102_v56 = vadd.f32 %v1101_v20, %v1100_v8 }
 0x2d1   : > { %v1135_v15 = vadd.f32 %v1134_v39, %v1133_v54  ;;  %v1402_v19 = vsel %vm1398_vm14, %v1397_v5, %v1368_v32  ;;  %v1168_v0 = vadd.f32 %v1167_v62, %v1166_v30  ;;  %v1203_v10 = vadd.f32 %v1202_v3, %v1201_v31 }
 0x2d2   : > { %v1436_v25 = vadd.f32 %v1432_v21, %v1402_v19  ;;  %v1238_v41 = vadd.f32 %v1237_v16, %v1236_v4  ;;  %v1271_v18 = vsel %vm1095_vm0, %v1267_v17, 0.0  ;;  %v1302_v24 = vsel %vm2798_vm7, %v3223_v44, 0.0 }
 0x2d3   : > { %v1136_v40 = vrot.slane %v1135_v15, 1  ;;  %v1169_v14 = vrot.slane %v1168_v0, 2  ;;  %v1204_v22 = vrot.slane %v1203_v10, 2  ;;  %v1272_v23 = vrot.slane %v1271_v18, 4 }
 0x2d4   : > { %1440 = vst [vmem:[%s3148_s6 + $0x18] sm:$0xff] %v1436_v25  ;;  %1704 = vmatprep.mubr.f32.mxu0 %v1436_v25  ;;  %v1239_v27 = vrot.slane %v1238_v41, 2  ;;  %v1306_v21 = vsel %vm1095_vm0, %v1302_v24, 0.0  ;;  %v1337_v59 = vsel %vm2803_vm8, %v3223_v44, 0.0  ;;  %v3226_v49 = vsub.s32 0, %v3225_v11 }
 0x2d5   : > { %v1137_v58 = vadd.f32 %v1136_v40, %v1135_v15  ;;  %v1170_v35 = vadd.f32 %v1169_v14, %v1168_v0  ;;  %v1205_v28 = vadd.f32 %v1204_v22, %v1203_v10  ;;  %v1273_v46 = vadd.f32 %v1272_v23, %v1271_v18 }
 0x2d6   : > { %v1307_v2 = vrot.slane %v1306_v21, 4  ;;  %v1240_v43 = vadd.f32 %v1239_v27, %v1238_v41  ;;  %v1341_v9 = vsel %vm1095_vm0, %v1337_v59, 0.0  ;;  %v1412_v45 = vrot.slane %v3227_v50, %v3226_v49 }
 0x2d7   : > { %v1370_v48 = vsel %vm1369_vm9, %v1102_v56, %v1137_v58  ;;  %v1171_v12 = vrot.slane %v1170_v35, 1  ;;  %v1206_v34 = vrot.slane %v1205_v28, 1  ;;  %v1274_v51 = vrot.slane %v1273_v46, 2 }
 0x2d8   : > { %v1308_v52 = vadd.f32 %v1307_v2, %v1306_v21  ;;  %v1241_v26 = vrot.slane %v1240_v43, 1  ;;  %v1342_v44 = vrot.slane %v1341_v9, 4  ;;  %v1429_v57 = vmul.f32 %v1412_v45, %v1403_v42 }
 0x2d9   : > { %v1093_v47 = vsel %vm2743_vm1, %v3228_v33, 0.0  ;;  %v1172_v13 = vadd.f32 %v1171_v12, %v1170_v35  ;;  %v1207_v53 = vadd.f32 %v1206_v34, %v1205_v28  ;;  %v1275_v54 = vadd.f32 %v1274_v51, %v1273_v46 }
 0x2da   : > { %v1309_v8 = vrot.slane %v1308_v52, 2  ;;  %v1242_v30 = vadd.f32 %v1241_v26, %v1240_v43  ;;  %v1343_v31 = vadd.f32 %v1342_v44, %v1341_v9  ;;  %v1110_v60 = vsel %vm1095_vm0, %v1093_v47, 0.0 }
 0x2db   : > { %v1129_v61 = vsel %vm2748_vm2, %v3228_v33, 0.0  ;;  %v1276_v32 = vrot.slane %v1275_v54, 1  ;;  %v1375_v39 = vsel %vm1374_vm10, %v1370_v48, %v1172_v13  ;;  %v1111_v20 = vrot.slane %v1110_v60, 4 }
 0x2dc   : > { %v1310_v36 = vadd.f32 %v1309_v8, %v1308_v52  ;;  %v1344_v62 = vrot.slane %v1343_v31, 2  ;;  %v1380_v37 = vsel %vm1379_vm11, %v1375_v39, %v1207_v53  ;;  %v1145_v3 = vsel %vm1095_vm0, %v1129_v61, 0.0 }
 0x2dd   : > { %v1164_v4 = vsel %vm2753_vm3, %v3228_v33, 0.0  ;;  %v1277_v5 = vadd.f32 %v1276_v32, %v1275_v54  ;;  %v1384_v16 = vsel %vm1095_vm0, %v1380_v37, %v1242_v30  ;;  %v1112_v29 = vadd.f32 %v1111_v20, %v1110_v60 }
 0x2de   : > { %v1311_v15 = vrot.slane %v1310_v36, 1  ;;  %v1345_v17 = vadd.f32 %v1344_v62, %v1343_v31  ;;  %v1146_v19 = vrot.slane %v1145_v3, 4  ;;  %v1180_v56 = vsel %vm1095_vm0, %v1164_v4, 0.0 }
 0x2df   : > { %v1199_v0 = vsel %vm2771_vm4, %v3228_v33, 0.0  ;;  %v1389_v25 = vsel %vm1388_vm12, %v1384_v16, %v1277_v5  ;;  %v1113_v40 = vrot.slane %v1112_v29, 2  ;;  %v1181_v41 = vrot.slane %v1180_v56, 4 }
 0x2e0   : > { %v1312_v10 = vadd.f32 %v1311_v15, %v1310_v36  ;;  %v1346_v38 = vrot.slane %v1345_v17, 1  ;;  %v1147_v18 = vadd.f32 %v1146_v19, %v1145_v3  ;;  %v1215_v14 = vsel %vm1095_vm0, %v1199_v0, 0.0 }
 0x2e1   : > { %v1234_v22 = vsel %vm2788_vm5, %v3228_v33, 0.0  ;;  %v1114_v24 = vadd.f32 %v1113_v40, %v1112_v29  ;;  %v1182_v58 = vadd.f32 %v1181_v41, %v1180_v56  ;;  %v1216_v27 = vrot.slane %v1215_v14, 4 }
 0x2e2   : > { %v1394_v23 = vsel %vm1393_vm13, %v1389_v25, %v1312_v10  ;;  %v1347_v63 = vadd.f32 %v1346_v38, %v1345_v17  ;;  %v1148_v21 = vrot.slane %v1147_v18, 2  ;;  %v1250_v59 = vsel %vm1095_vm0, %v1234_v22, 0.0  ;;  %v1405_v10 = vld [vmem:[#allocation2 + $0x10] sm:$0xff] }
 0x2e3   : > { %v1269_v35 = vsel %vm2793_vm6, %v3228_v33, 0.0  ;;  %v1115_v28 = vrot.slane %v1114_v24, 1  ;;  %v1183_v46 = vrot.slane %v1182_v58, 2  ;;  %v1217_v2 = vadd.f32 %v1216_v27, %v1215_v14 }
 0x2e4   : > { %v1251_v42 = vrot.slane %v1250_v59, 4  ;;  %v1399_v6 = vsel %vm1398_vm14, %v1394_v23, %v1347_v63  ;;  %v1149_v43 = vadd.f32 %v1148_v21, %v1147_v18  ;;  %v1285_v9 = vsel %vm1095_vm0, %v1269_v35, 0.0 }
 0x2e5   : > { %v1304_v48 = vsel %vm2798_vm7, %v3228_v33, 0.0  ;;  %v1433_v49 = vadd.f32 %v1429_v57, %v1399_v6  ;;  %v1116_v45 = vadd.f32 %v1115_v28, %v1114_v24  ;;  %v1184_v12 = vadd.f32 %v1183_v46, %v1182_v58 }
 0x2e6   : > { %v1218_v34 = vrot.slane %v1217_v2, 2  ;;  %v1150_v51 = vrot.slane %v1149_v43, 1  ;;  %v1252_v7 = vadd.f32 %v1251_v42, %v1250_v59  ;;  %v1286_v52 = vrot.slane %v1285_v9, 4 }
 0x2e7   : > { %v1320_v26 = vsel %vm1095_vm0, %v1304_v48, 0.0  ;;  %1437 = vst [vmem:[%s3148_s6] sm:$0xff] %v1433_v49  ;;  %1634 = vmatmul.mubr.f32.vlgmr.msra.gmra.mrb[0].mxu1 %v1433_v49  ;;  %v1185_v44 = vrot.slane %v1184_v12, 1  ;;  %v1339_v1 = vsel %vm2803_vm8, %v3228_v33, 0.0  ;;  %v1419_v20 = vsub.s32 2, %v3225_v11 }
 0x2e8   : > { %v1219_v47 = vadd.f32 %v1218_v34, %v1217_v2  ;;  %v1321_v13 = vrot.slane %v1320_v26, 4  ;;  %v1151_v57 = vadd.f32 %v1150_v51, %v1149_v43  ;;  %v1253_v53 = vrot.slane %v1252_v7, 2 }
 0x2e9   : > { %v1287_v54 = vadd.f32 %v1286_v52, %v1285_v9  ;;  %v1355_v8 = vsel %vm1095_vm0, %v1339_v1, 0.0  ;;  %v1186_v30 = vadd.f32 %v1185_v44, %v1184_v12  ;;  %v1420_v19 = vrot.slane %v3227_v50, %v1419_v20 }
 0x2ea   : > { %v1220_v31 = vrot.slane %v1219_v47, 1  ;;  %v1322_v60 = vadd.f32 %v1321_v13, %v1320_v26  ;;  %v1356_v61 = vrot.slane %v1355_v8, 4  ;;  %v1254_v32 = vadd.f32 %v1253_v53, %v1252_v7 }
 0x2eb   : > { %v1288_v36 = vrot.slane %v1287_v54, 2  ;;  %v1372_v39 = vsel %vm1369_vm9, %v1116_v45, %v1151_v57  ;;  %v1431_v18 = vmul.f32 %v1420_v19, %v1405_v10 }
 0x2ec   : > { %v1221_v62 = vadd.f32 %v1220_v31, %v1219_v47  ;;  %v1323_v37 = vrot.slane %v1322_v60, 2  ;;  %v1357_v3 = vadd.f32 %v1356_v61, %v1355_v8  ;;  %v1377_v55 = vsel %vm1374_vm10, %v1372_v39, %v1186_v30 }
 0x2ed   : > { %v1255_v33 = vrot.slane %v1254_v32, 1  ;;  %v1289_v4 = vadd.f32 %v1288_v36, %v1287_v54 }
 0x2ee   : > { %v1324_v5 = vadd.f32 %v1323_v37, %v1322_v60  ;;  %v1358_v15 = vrot.slane %v1357_v3, 2  ;;  %v1382_v16 = vsel %vm1379_vm11, %v1377_v55, %v1221_v62 }
 0x2ef   : > { %v1256_v29 = vadd.f32 %v1255_v33, %v1254_v32  ;;  %v1290_v17 = vrot.slane %v1289_v4, 1 }
 0x2f0   : > { %v1325_v56 = vrot.slane %v1324_v5, 1  ;;  %v1359_v0 = vadd.f32 %v1358_v15, %v1357_v3 }
 0x2f1   : > { %v1291_v25 = vadd.f32 %v1290_v17, %v1289_v4  ;;  %v1386_v11 = vsel %vm1095_vm0, %v1382_v16, %v1256_v29 }
 0x2f2   : > { %v1326_v40 = vadd.f32 %v1325_v56, %v1324_v5  ;;  %v1360_v41 = vrot.slane %v1359_v0, 1 }
 0x2f3   : > { %v1391_v38 = vsel %vm1388_vm12, %v1386_v11, %v1291_v25 }
 0x2f4   : > { %v1361_v14 = vadd.f32 %v1360_v41, %v1359_v0  ;;  %v1396_v22 = vsel %vm1393_vm13, %v1391_v38, %v1326_v40 }
 0x2f6   : > { %v1401_v23 = vsel %vm1398_vm14, %v1396_v22, %v1361_v14 }
 0x2f7   : > { %v1435_v24 = vadd.f32 %v1431_v18, %v1401_v23 }
 0x2f9   : > { %1439 = vst [vmem:[%s3148_s6 + $0x10] sm:$0xff] %v1435_v24  ;;  %1705 = vmatmul.mubr.f32.vlgmr.msra.gmra.mrb[0].mxu0 %v1435_v24 }
 0x3ba   : > { %v1635_v50 = vpop.f32.mrb[0].mxu1 }
 0x3bb   : > { %v1637_v58 = vpop.f32.mrb[1].mxu1 }
 0x3cc   : > { %v1706_v27 = vpop.f32.mrb[0].mxu0 }
 0x3cd   : > { %v1707_v63 = vadd.f32 %v1706_v27, %v1635_v50  ;;  %v1708_v21 = vpop.f32.mrb[1].mxu0 }
 0x3ce   : > { %v1709_v59 = vadd.f32 %v1708_v21, %v1637_v58 }
 0x3cf   : > { %1711 = vst [vmem:[%s3149_s7] sm:$0xff] %v1707_v63 }
 0x3d0   : > { %1712 = vst [vmem:[%s3149_s7 + $0x8] sm:$0xff] %v1709_v59 }
 0x3d1 PF: > { %p26_p9 = scmp.ge.s32.totalorder %s2381_s22, 5   ;;  %s3229_s29 = smov %s2199_s0 }
 0x3d2   : > { %s3230_s0 = smov %s2203_s30  ;;  %s3231_s30 = smov %s2391_s25 }
 0x3d3   : > { %s3232_s8 = smov %s2381_s22  ;;  %28 = sbr.rel (!%p26_p9) target bundleno = 20 (0x14), region = 107 }
 0x3da   :  { %1730 = vsyncpa [#allocation6], 1 }
 0x3db   :  { %1732 = vsyncpa [#allocation6 + $0x1], 1 }
 0x3dc   :  { %1733 = vsyncpa [#allocation8], 1 }
 0x3dd   :  { %1734 = vsyncpa [#allocation11], 1 }

</bundles_post_ra>
